<compile_context>
chip_gen: v7x
topology: tpu7x:2x2x1
jax: 0.10.0
libtpu: 0.0.40
codegen_flags: <defaults>
</compile_context>

<pallas_src>
import jax
import jax.numpy as jnp
from jax.experimental import pallas as pl
from jax.experimental.pallas import tpu as pltpu

# ------------------------- model hyper-params (small, per prompt) -------------------------
INPUT_SIZE = 72     # len(charspace) in the original module
HIDDEN = 32
NUM_LAYERS = 2
NUM_CLASSES = 72
C_PAD = 128         # cover_fc output padded to one full lane width (72 -> 128)
SEQ = 8
BATCH = 2


# ------------------------- fused Pallas kernel -------------------------
def _covered_lstm_kernel(x_ref, wih0_ref, whh0_ref, b0_ref,
                         wih1_ref, whh1_ref, b1_ref,
                         h0_ref, c0_ref,
                         w1_ref, fb1_ref, w2_ref, fb2_ref,
                         out_ref, hn_ref, cn_ref):
    """Entire CoveredLSTM forward in one kernel invocation (grid=()).

    x_ref: (SEQ*B, INPUT_SIZE), row order row = t*B + b (time-major like nn.LSTM).
    """
    H = HIDDEN
    B = h0_ref.shape[1]
    seq = x_ref.shape[0] // B

    def run_layer(gx, whh_t, h, c):
        # gx: (seq*B, 4H) = precomputed x @ W_ih + (b_ih + b_hh), hoisted out of recurrence.
        ys = []
        for t in range(seq):                                    # static, tiny -> unroll
            gates = gx[t * B:(t + 1) * B, :] + jnp.dot(
                h, whh_t, preferred_element_type=jnp.float32)   # (B, 4H)
            sg = jax.nn.sigmoid(gates)                          # full-width (128-lane) EUP op
            th = jnp.tanh(gates)                                # full-width EUP op
            i_g = sg[:, 0:H]
            f_g = sg[:, H:2 * H]
            g_g = th[:, 2 * H:3 * H]
            o_g = sg[:, 3 * H:4 * H]
            c = f_g * c + i_g * g_g
            h = o_g * jnp.tanh(c)
            ys.append(h)
        return jnp.concatenate(ys, axis=0), h, c                # (seq*B, H), (B,H), (B,H)

    # ---- layer 0: one batched input-projection matmul over all timesteps ----
    gx0 = jnp.dot(x_ref[...], wih0_ref[...],
                  preferred_element_type=jnp.float32) + b0_ref[...]
    y0, hn0, cn0 = run_layer(gx0, whh0_ref[...], h0_ref[0], c0_ref[0])

    # ---- layer 1 ----
    gx1 = jnp.dot(y0, wih1_ref[...],
                  preferred_element_type=jnp.float32) + b1_ref[...]
    y1, hn1, cn1 = run_layer(gx1, whh1_ref[...], h0_ref[1], c0_ref[1])

    # ---- stack_fc -> dropout -> cover_fc (columns padded to 128 lanes) ----
    # TODO(synk): nn.Dropout(0.1) training-mode masking (pltpu.prng_*) not implemented; eval-mode identity.
    s = jnp.dot(y1, w1_ref[...], preferred_element_type=jnp.float32) + fb1_ref[...]
    out = jnp.dot(s, w2_ref[...], preferred_element_type=jnp.float32) + fb2_ref[...]
    out_ref[...] = out.astype(out_ref.dtype)                    # single lane-dense store

    hn_ref[0] = hn0.astype(hn_ref.dtype)
    hn_ref[1] = hn1.astype(hn_ref.dtype)
    cn_ref[0] = cn0.astype(cn_ref.dtype)
    cn_ref[1] = cn1.astype(cn_ref.dtype)


# ------------------------- wrapper -------------------------
def _cost_estimate():
    G = 4 * HIDDEN
    mm = lambda m, k, n: 2 * m * k * n
    flops = (mm(SEQ * BATCH, INPUT_SIZE, G)         # gx0
             + mm(SEQ * BATCH, HIDDEN, G)           # gx1
             + 2 * SEQ * mm(BATCH, HIDDEN, G)       # recurrent h @ Whh, both layers
             + mm(SEQ * BATCH, HIDDEN, HIDDEN)      # stack_fc
             + mm(SEQ * BATCH, HIDDEN, C_PAD))      # cover_fc (padded)
    transcendentals = 2 * SEQ * (2 * BATCH * G + BATCH * HIDDEN)
    bytes_accessed = 4 * (SEQ * BATCH * INPUT_SIZE
                          + INPUT_SIZE * G + HIDDEN * G + G      # layer-0 weights + bias
                          + 2 * HIDDEN * G + G                   # layer-1 weights + bias
                          + 2 * NUM_LAYERS * BATCH * HIDDEN      # h0 / c0
                          + HIDDEN * HIDDEN + HIDDEN             # stack_fc
                          + HIDDEN * C_PAD + C_PAD               # cover_fc (padded)
                          + SEQ * BATCH * C_PAD                  # output
                          + 2 * NUM_LAYERS * BATCH * HIDDEN)     # hn / cn
    return pl.CostEstimate(flops=flops, transcendentals=transcendentals,
                           bytes_accessed=bytes_accessed)


def _fused_forward(x2d, wih0, whh0, b0, wih1, whh1, b1, h0, c0, w1, fb1, w2p, fb2):
    vmem = lambda: pl.BlockSpec(memory_space=pltpu.MemorySpace.VMEM)
    return pl.pallas_call(
        _covered_lstm_kernel,
        out_shape=(jax.ShapeDtypeStruct((SEQ * BATCH, C_PAD), jnp.float32),
                   jax.ShapeDtypeStruct((NUM_LAYERS, BATCH, HIDDEN), jnp.float32),
                   jax.ShapeDtypeStruct((NUM_LAYERS, BATCH, HIDDEN), jnp.float32)),
        in_specs=[vmem() for _ in range(13)],
        out_specs=(vmem(), vmem(), vmem()),
        cost_estimate=_cost_estimate(),
    )(x2d, wih0, whh0, b0, wih1, whh1, b1, h0, c0, w1, fb1, w2p, fb2)


@jax.jit
def covered_lstm_forward(inputs, h0, c0, params):
    """Equivalent of CoveredLSTM.forward(inputs, (h0, c0)) for un-packed inputs (eval mode)."""
    seq, B, Din = inputs.shape
    x2d = inputs.reshape(seq * B, Din)                 # row = t*B + b (time-major)
    (wih0, whh0, b0), (wih1, whh1, b1) = params["lstm"]
    w1, fb1, w2p, fb2 = params["fc"]
    out_pad, hn, cn = _fused_forward(x2d, wih0, whh0, b0, wih1, whh1, b1,
                                     h0, c0, w1, fb1, w2p, fb2)
    covered = out_pad[:, :NUM_CLASSES].reshape(seq, B, NUM_CLASSES)
    return covered, (hn, cn)


# ------------------------- deterministic param init (PyTorch-style uniform) -------------------------
def init_params(key):
    k_lstm = 1.0 / jnp.sqrt(jnp.float32(HIDDEN))
    params = {"lstm": [], "fc": None}
    for l in range(NUM_LAYERS):
        din = INPUT_SIZE if l == 0 else HIDDEN
        key, k1, k2, k3, k4 = jax.random.split(key, 5)
        w_ih = jax.random.uniform(k1, (4 * HIDDEN, din), jnp.float32, -k_lstm, k_lstm)
        w_hh = jax.random.uniform(k2, (4 * HIDDEN, HIDDEN), jnp.float32, -k_lstm, k_lstm)
        b_ih = jax.random.uniform(k3, (4 * HIDDEN,), jnp.float32, -k_lstm, k_lstm)
        b_hh = jax.random.uniform(k4, (4 * HIDDEN,), jnp.float32, -k_lstm, k_lstm)
        # pre-transpose weights; combine biases; bias stored as (1, 4H)
        params["lstm"].append((w_ih.T, w_hh.T, (b_ih + b_hh).reshape(1, 4 * HIDDEN)))

    key, k1, k2, k3, k4 = jax.random.split(key, 5)
    kf = 1.0 / jnp.sqrt(jnp.float32(HIDDEN))
    w1 = jax.random.uniform(k1, (HIDDEN, HIDDEN), jnp.float32, -kf, kf)        # stack_fc.weight
    b1 = jax.random.uniform(k2, (HIDDEN,), jnp.float32, -kf, kf)
    w2 = jax.random.uniform(k3, (NUM_CLASSES, HIDDEN), jnp.float32, -kf, kf)   # cover_fc.weight
    b2 = jax.random.uniform(k4, (NUM_CLASSES,), jnp.float32, -kf, kf)
    # zero-pad cover_fc to 128 output columns (lane-dense kernel store)
    w2_t = jnp.zeros((HIDDEN, C_PAD), jnp.float32).at[:, :NUM_CLASSES].set(w2.T)
    b2_p = jnp.zeros((1, C_PAD), jnp.float32).at[0, :NUM_CLASSES].set(b2)
    params["fc"] = (w1.T, b1.reshape(1, HIDDEN), w2_t, b2_p)
    return params


# ------------------------- pure-JAX reference for correctness -------------------------
def reference_forward(inputs, h0, c0, params):
    layer_in = inputs
    hns, cns = [], []
    for l in range(NUM_LAYERS):
        wih_t, whh_t, b = params["lstm"][l]

        def step(carry, x_t):
            h, c = carry
            gates = x_t @ wih_t + h @ whh_t + b[0]
            i_g, f_g, g_g, o_g = jnp.split(gates, 4, axis=-1)
            i_g = jax.nn.sigmoid(i_g)
            f_g = jax.nn.sigmoid(f_g)
            g_g = jnp.tanh(g_g)
            o_g = jax.nn.sigmoid(o_g)
            c = f_g * c + i_g * g_g
            h = o_g * jnp.tanh(c)
            return (h, c), h

        (hn, cn), ys = jax.lax.scan(step, (h0[l], c0[l]), layer_in)
        layer_in = ys
        hns.append(hn)
        cns.append(cn)
    w1_t, b1, w2_t, b2 = params["fc"]
    stack = layer_in @ w1_t + b1[0]
    covered = (stack @ w2_t + b2[0])[..., :NUM_CLASSES]
    return covered, (jnp.stack(hns), jnp.stack(cns))


if __name__ == "__main__":
    key = jax.random.PRNGKey(0)
    key, kx = jax.random.split(key)
    params = init_params(key)

    inputs = jax.random.normal(kx, (SEQ, BATCH, INPUT_SIZE), jnp.float32)
    # init_cache(): zeros (num_layers, batch, hidden)
    h0 = jnp.zeros((NUM_LAYERS, BATCH, HIDDEN), jnp.float32)
    c0 = jnp.zeros((NUM_LAYERS, BATCH, HIDDEN), jnp.float32)

    covered, (hn, cn) = covered_lstm_forward(inputs, h0, c0, params)
    jax.block_until_ready((covered, hn, cn))

    ref_out, (ref_hn, ref_cn) = reference_forward(inputs, h0, c0, params)
    assert covered.shape == (SEQ, BATCH, NUM_CLASSES)
    assert hn.shape == (NUM_LAYERS, BATCH, HIDDEN) and cn.shape == (NUM_LAYERS, BATCH, HIDDEN)
    assert jnp.allclose(covered, ref_out, atol=1e-4, rtol=1e-4)
    assert jnp.allclose(hn, ref_hn, atol=1e-4, rtol=1e-4)
    assert jnp.allclose(cn, ref_cn, atol=1e-4, rtol=1e-4)

    print("KERNEL_OK")
</pallas_src>

<mosaic_0001>
module attributes {stable_mosaic.version = 11 : i64} {
  func.func @_covered_lstm_kernel(%arg0: memref<16x72xf32, #tpu.memory_space<vmem>>, %arg1: memref<72x128xf32, #tpu.memory_space<vmem>>, %arg2: memref<32x128xf32, #tpu.memory_space<vmem>>, %arg3: memref<1x128xf32, #tpu.memory_space<vmem>>, %arg4: memref<32x128xf32, #tpu.memory_space<vmem>>, %arg5: memref<32x128xf32, #tpu.memory_space<vmem>>, %arg6: memref<1x128xf32, #tpu.memory_space<vmem>>, %arg7: memref<2x2x32xf32, #tpu.memory_space<vmem>>, %arg8: memref<2x2x32xf32, #tpu.memory_space<vmem>>, %arg9: memref<32x32xf32, #tpu.memory_space<vmem>>, %arg10: memref<1x32xf32, #tpu.memory_space<vmem>>, %arg11: memref<32x128xf32, #tpu.memory_space<vmem>>, %arg12: memref<1x128xf32, #tpu.memory_space<vmem>>, %arg13: memref<16x128xf32, #tpu.memory_space<vmem>>, %arg14: memref<2x2x32xf32, #tpu.memory_space<vmem>>, %arg15: memref<2x2x32xf32, #tpu.memory_space<vmem>>) attributes {dimension_semantics = [], scalar_prefetch = 0 : i64, scratch_operands = 0 : i64, tpu.core_type = #tpu.core_type<tc>} {
    %c0 = arith.constant 0 : index
    %c0_0 = arith.constant 0 : index
    %0 = vector.load %arg0[%c0, %c0_0] : memref<16x72xf32, #tpu.memory_space<vmem>>, vector<16x72xf32>
    %c0_1 = arith.constant 0 : index
    %c0_2 = arith.constant 0 : index
    %1 = vector.load %arg1[%c0_1, %c0_2] : memref<72x128xf32, #tpu.memory_space<vmem>>, vector<72x128xf32>
    %cst = arith.constant dense<0.000000e+00> : vector<16x128xf32>
    %2 = tpu.matmul %0, %1, %cst {dimension_numbers = #tpu.dot_dimension_numbers<[1], [0], [0], [1], [0, 0, 1, 1], [], []>} : vector<16x72xf32>, vector<72x128xf32>, vector<16x128xf32> -> vector<16x128xf32>
    %c0_3 = arith.constant 0 : index
    %c0_4 = arith.constant 0 : index
    %3 = vector.load %arg3[%c0_3, %c0_4] : memref<1x128xf32, #tpu.memory_space<vmem>>, vector<1x128xf32>
    %4 = vector.broadcast %3 : vector<1x128xf32> to vector<16x128xf32>
    %5 = arith.addf %2, %4 : vector<16x128xf32>
    %c0_5 = arith.constant 0 : index
    %c0_6 = arith.constant 0 : index
    %6 = vector.load %arg2[%c0_5, %c0_6] : memref<32x128xf32, #tpu.memory_space<vmem>>, vector<32x128xf32>
    %c0_7 = arith.constant 0 : index
    %c0_8 = arith.constant 0 : index
    %c0_9 = arith.constant 0 : index
    %7 = vector.load %arg7[%c0_7, %c0_8, %c0_9] : memref<2x2x32xf32, #tpu.memory_space<vmem>>, vector<1x2x32xf32>
    %8 = vector.shape_cast %7 : vector<1x2x32xf32> to vector<2x32xf32>
    %c0_10 = arith.constant 0 : index
    %c0_11 = arith.constant 0 : index
    %c0_12 = arith.constant 0 : index
    %9 = vector.load %arg8[%c0_10, %c0_11, %c0_12] : memref<2x2x32xf32, #tpu.memory_space<vmem>>, vector<1x2x32xf32>
    %10 = vector.shape_cast %9 : vector<1x2x32xf32> to vector<2x32xf32>
    %11 = vector.extract_strided_slice %5 {offsets = [0, 0], sizes = [2, 128], strides = [1, 1]} : vector<16x128xf32> to vector<2x128xf32>
    %cst_13 = arith.constant dense<0.000000e+00> : vector<2x128xf32>
    %12 = tpu.matmul %8, %6, %cst_13 {dimension_numbers = #tpu.dot_dimension_numbers<[1], [0], [0], [1], [0, 0, 1, 1], [], []>} : vector<2x32xf32>, vector<32x128xf32>, vector<2x128xf32> -> vector<2x128xf32>
    %13 = arith.addf %11, %12 : vector<2x128xf32>
    %14 = arith.negf %13 : vector<2x128xf32>
    %15 = math.exp %14 : vector<2x128xf32>
    %cst_14 = arith.constant 1.000000e+00 : f32
    %16 = vector.broadcast %cst_14 : f32 to vector<2x128xf32>
    %17 = arith.addf %16, %15 : vector<2x128xf32>
    %18 = arith.divf %16, %17 : vector<2x128xf32>
    %19 = math.tanh %13 : vector<2x128xf32>
    %20 = vector.extract_strided_slice %18 {offsets = [0, 0], sizes = [2, 32], strides = [1, 1]} : vector<2x128xf32> to vector<2x32xf32>
    %21 = vector.extract_strided_slice %18 {offsets = [0, 32], sizes = [2, 32], strides = [1, 1]} : vector<2x128xf32> to vector<2x32xf32>
    %22 = vector.extract_strided_slice %19 {offsets = [0, 64], sizes = [2, 32], strides = [1, 1]} : vector<2x128xf32> to vector<2x32xf32>
    %23 = vector.extract_strided_slice %18 {offsets = [0, 96], sizes = [2, 32], strides = [1, 1]} : vector<2x128xf32> to vector<2x32xf32>
    %24 = arith.mulf %21, %10 : vector<2x32xf32>
    %25 = arith.mulf %20, %22 : vector<2x32xf32>
    %26 = arith.addf %24, %25 : vector<2x32xf32>
    %27 = math.tanh %26 : vector<2x32xf32>
    %28 = arith.mulf %23, %27 : vector<2x32xf32>
    %29 = vector.extract_strided_slice %5 {offsets = [2, 0], sizes = [2, 128], strides = [1, 1]} : vector<16x128xf32> to vector<2x128xf32>
    %cst_15 = arith.constant dense<0.000000e+00> : vector<2x128xf32>
    %30 = tpu.matmul %28, %6, %cst_15 {dimension_numbers = #tpu.dot_dimension_numbers<[1], [0], [0], [1], [0, 0, 1, 1], [], []>} : vector<2x32xf32>, vector<32x128xf32>, vector<2x128xf32> -> vector<2x128xf32>
    %31 = arith.addf %29, %30 : vector<2x128xf32>
    %32 = arith.negf %31 : vector<2x128xf32>
    %33 = math.exp %32 : vector<2x128xf32>
    %cst_16 = arith.constant 1.000000e+00 : f32
    %34 = vector.broadcast %cst_16 : f32 to vector<2x128xf32>
    %35 = arith.addf %34, %33 : vector<2x128xf32>
    %36 = arith.divf %34, %35 : vector<2x128xf32>
    %37 = math.tanh %31 : vector<2x128xf32>
    %38 = vector.extract_strided_slice %36 {offsets = [0, 0], sizes = [2, 32], strides = [1, 1]} : vector<2x128xf32> to vector<2x32xf32>
    %39 = vector.extract_strided_slice %36 {offsets = [0, 32], sizes = [2, 32], strides = [1, 1]} : vector<2x128xf32> to vector<2x32xf32>
    %40 = vector.extract_strided_slice %37 {offsets = [0, 64], sizes = [2, 32], strides = [1, 1]} : vector<2x128xf32> to vector<2x32xf32>
    %41 = vector.extract_strided_slice %36 {offsets = [0, 96], sizes = [2, 32], strides = [1, 1]} : vector<2x128xf32> to vector<2x32xf32>
    %42 = arith.mulf %39, %26 : vector<2x32xf32>
    %43 = arith.mulf %38, %40 : vector<2x32xf32>
    %44 = arith.addf %42, %43 : vector<2x32xf32>
    %45 = math.tanh %44 : vector<2x32xf32>
    %46 = arith.mulf %41, %45 : vector<2x32xf32>
    %47 = vector.extract_strided_slice %5 {offsets = [4, 0], sizes = [2, 128], strides = [1, 1]} : vector<16x128xf32> to vector<2x128xf32>
    %cst_17 = arith.constant dense<0.000000e+00> : vector<2x128xf32>
    %48 = tpu.matmul %46, %6, %cst_17 {dimension_numbers = #tpu.dot_dimension_numbers<[1], [0], [0], [1], [0, 0, 1, 1], [], []>} : vector<2x32xf32>, vector<32x128xf32>, vector<2x128xf32> -> vector<2x128xf32>
    %49 = arith.addf %47, %48 : vector<2x128xf32>
    %50 = arith.negf %49 : vector<2x128xf32>
    %51 = math.exp %50 : vector<2x128xf32>
    %cst_18 = arith.constant 1.000000e+00 : f32
    %52 = vector.broadcast %cst_18 : f32 to vector<2x128xf32>
    %53 = arith.addf %52, %51 : vector<2x128xf32>
    %54 = arith.divf %52, %53 : vector<2x128xf32>
    %55 = math.tanh %49 : vector<2x128xf32>
    %56 = vector.extract_strided_slice %54 {offsets = [0, 0], sizes = [2, 32], strides = [1, 1]} : vector<2x128xf32> to vector<2x32xf32>
    %57 = vector.extract_strided_slice %54 {offsets = [0, 32], sizes = [2, 32], strides = [1, 1]} : vector<2x128xf32> to vector<2x32xf32>
    %58 = vector.extract_strided_slice %55 {offsets = [0, 64], sizes = [2, 32], strides = [1, 1]} : vector<2x128xf32> to vector<2x32xf32>
    %59 = vector.extract_strided_slice %54 {offsets = [0, 96], sizes = [2, 32], strides = [1, 1]} : vector<2x128xf32> to vector<2x32xf32>
    %60 = arith.mulf %57, %44 : vector<2x32xf32>
    %61 = arith.mulf %56, %58 : vector<2x32xf32>
    %62 = arith.addf %60, %61 : vector<2x32xf32>
    %63 = math.tanh %62 : vector<2x32xf32>
    %64 = arith.mulf %59, %63 : vector<2x32xf32>
    %65 = vector.extract_strided_slice %5 {offsets = [6, 0], sizes = [2, 128], strides = [1, 1]} : vector<16x128xf32> to vector<2x128xf32>
    %cst_19 = arith.constant dense<0.000000e+00> : vector<2x128xf32>
    %66 = tpu.matmul %64, %6, %cst_19 {dimension_numbers = #tpu.dot_dimension_numbers<[1], [0], [0], [1], [0, 0, 1, 1], [], []>} : vector<2x32xf32>, vector<32x128xf32>, vector<2x128xf32> -> vector<2x128xf32>
    %67 = arith.addf %65, %66 : vector<2x128xf32>
    %68 = arith.negf %67 : vector<2x128xf32>
    %69 = math.exp %68 : vector<2x128xf32>
    %cst_20 = arith.constant 1.000000e+00 : f32
    %70 = vector.broadcast %cst_20 : f32 to vector<2x128xf32>
    %71 = arith.addf %70, %69 : vector<2x128xf32>
    %72 = arith.divf %70, %71 : vector<2x128xf32>
    %73 = math.tanh %67 : vector<2x128xf32>
    %74 = vector.extract_strided_slice %72 {offsets = [0, 0], sizes = [2, 32], strides = [1, 1]} : vector<2x128xf32> to vector<2x32xf32>
    %75 = vector.extract_strided_slice %72 {offsets = [0, 32], sizes = [2, 32], strides = [1, 1]} : vector<2x128xf32> to vector<2x32xf32>
    %76 = vector.extract_strided_slice %73 {offsets = [0, 64], sizes = [2, 32], strides = [1, 1]} : vector<2x128xf32> to vector<2x32xf32>
    %77 = vector.extract_strided_slice %72 {offsets = [0, 96], sizes = [2, 32], strides = [1, 1]} : vector<2x128xf32> to vector<2x32xf32>
    %78 = arith.mulf %75, %62 : vector<2x32xf32>
    %79 = arith.mulf %74, %76 : vector<2x32xf32>
    %80 = arith.addf %78, %79 : vector<2x32xf32>
    %81 = math.tanh %80 : vector<2x32xf32>
    %82 = arith.mulf %77, %81 : vector<2x32xf32>
    %83 = vector.extract_strided_slice %5 {offsets = [8, 0], sizes = [2, 128], strides = [1, 1]} : vector<16x128xf32> to vector<2x128xf32>
    %cst_21 = arith.constant dense<0.000000e+00> : vector<2x128xf32>
    %84 = tpu.matmul %82, %6, %cst_21 {dimension_numbers = #tpu.dot_dimension_numbers<[1], [0], [0], [1], [0, 0, 1, 1], [], []>} : vector<2x32xf32>, vector<32x128xf32>, vector<2x128xf32> -> vector<2x128xf32>
    %85 = arith.addf %83, %84 : vector<2x128xf32>
    %86 = arith.negf %85 : vector<2x128xf32>
    %87 = math.exp %86 : vector<2x128xf32>
    %cst_22 = arith.constant 1.000000e+00 : f32
    %88 = vector.broadcast %cst_22 : f32 to vector<2x128xf32>
    %89 = arith.addf %88, %87 : vector<2x128xf32>
    %90 = arith.divf %88, %89 : vector<2x128xf32>
    %91 = math.tanh %85 : vector<2x128xf32>
    %92 = vector.extract_strided_slice %90 {offsets = [0, 0], sizes = [2, 32], strides = [1, 1]} : vector<2x128xf32> to vector<2x32xf32>
    %93 = vector.extract_strided_slice %90 {offsets = [0, 32], sizes = [2, 32], strides = [1, 1]} : vector<2x128xf32> to vector<2x32xf32>
    %94 = vector.extract_strided_slice %91 {offsets = [0, 64], sizes = [2, 32], strides = [1, 1]} : vector<2x128xf32> to vector<2x32xf32>
    %95 = vector.extract_strided_slice %90 {offsets = [0, 96], sizes = [2, 32], strides = [1, 1]} : vector<2x128xf32> to vector<2x32xf32>
    %96 = arith.mulf %93, %80 : vector<2x32xf32>
    %97 = arith.mulf %92, %94 : vector<2x32xf32>
    %98 = arith.addf %96, %97 : vector<2x32xf32>
    %99 = math.tanh %98 : vector<2x32xf32>
    %100 = arith.mulf %95, %99 : vector<2x32xf32>
    %101 = vector.extract_strided_slice %5 {offsets = [10, 0], sizes = [2, 128], strides = [1, 1]} : vector<16x128xf32> to vector<2x128xf32>
    %cst_23 = arith.constant dense<0.000000e+00> : vector<2x128xf32>
    %102 = tpu.matmul %100, %6, %cst_23 {dimension_numbers = #tpu.dot_dimension_numbers<[1], [0], [0], [1], [0, 0, 1, 1], [], []>} : vector<2x32xf32>, vector<32x128xf32>, vector<2x128xf32> -> vector<2x128xf32>
    %103 = arith.addf %101, %102 : vector<2x128xf32>
    %104 = arith.negf %103 : vector<2x128xf32>
    %105 = math.exp %104 : vector<2x128xf32>
    %cst_24 = arith.constant 1.000000e+00 : f32
    %106 = vector.broadcast %cst_24 : f32 to vector<2x128xf32>
    %107 = arith.addf %106, %105 : vector<2x128xf32>
    %108 = arith.divf %106, %107 : vector<2x128xf32>
    %109 = math.tanh %103 : vector<2x128xf32>
    %110 = vector.extract_strided_slice %108 {offsets = [0, 0], sizes = [2, 32], strides = [1, 1]} : vector<2x128xf32> to vector<2x32xf32>
    %111 = vector.extract_strided_slice %108 {offsets = [0, 32], sizes = [2, 32], strides = [1, 1]} : vector<2x128xf32> to vector<2x32xf32>
    %112 = vector.extract_strided_slice %109 {offsets = [0, 64], sizes = [2, 32], strides = [1, 1]} : vector<2x128xf32> to vector<2x32xf32>
    %113 = vector.extract_strided_slice %108 {offsets = [0, 96], sizes = [2, 32], strides = [1, 1]} : vector<2x128xf32> to vector<2x32xf32>
    %114 = arith.mulf %111, %98 : vector<2x32xf32>
    %115 = arith.mulf %110, %112 : vector<2x32xf32>
    %116 = arith.addf %114, %115 : vector<2x32xf32>
    %117 = math.tanh %116 : vector<2x32xf32>
    %118 = arith.mulf %113, %117 : vector<2x32xf32>
    %119 = vector.extract_strided_slice %5 {offsets = [12, 0], sizes = [2, 128], strides = [1, 1]} : vector<16x128xf32> to vector<2x128xf32>
    %cst_25 = arith.constant dense<0.000000e+00> : vector<2x128xf32>
    %120 = tpu.matmul %118, %6, %cst_25 {dimension_numbers = #tpu.dot_dimension_numbers<[1], [0], [0], [1], [0, 0, 1, 1], [], []>} : vector<2x32xf32>, vector<32x128xf32>, vector<2x128xf32> -> vector<2x128xf32>
    %121 = arith.addf %119, %120 : vector<2x128xf32>
    %122 = arith.negf %121 : vector<2x128xf32>
    %123 = math.exp %122 : vector<2x128xf32>
    %cst_26 = arith.constant 1.000000e+00 : f32
    %124 = vector.broadcast %cst_26 : f32 to vector<2x128xf32>
    %125 = arith.addf %124, %123 : vector<2x128xf32>
    %126 = arith.divf %124, %125 : vector<2x128xf32>
    %127 = math.tanh %121 : vector<2x128xf32>
    %128 = vector.extract_strided_slice %126 {offsets = [0, 0], sizes = [2, 32], strides = [1, 1]} : vector<2x128xf32> to vector<2x32xf32>
    %129 = vector.extract_strided_slice %126 {offsets = [0, 32], sizes = [2, 32], strides = [1, 1]} : vector<2x128xf32> to vector<2x32xf32>
    %130 = vector.extract_strided_slice %127 {offsets = [0, 64], sizes = [2, 32], strides = [1, 1]} : vector<2x128xf32> to vector<2x32xf32>
    %131 = vector.extract_strided_slice %126 {offsets = [0, 96], sizes = [2, 32], strides = [1, 1]} : vector<2x128xf32> to vector<2x32xf32>
    %132 = arith.mulf %129, %116 : vector<2x32xf32>
    %133 = arith.mulf %128, %130 : vector<2x32xf32>
    %134 = arith.addf %132, %133 : vector<2x32xf32>
    %135 = math.tanh %134 : vector<2x32xf32>
    %136 = arith.mulf %131, %135 : vector<2x32xf32>
    %137 = vector.extract_strided_slice %5 {offsets = [14, 0], sizes = [2, 128], strides = [1, 1]} : vector<16x128xf32> to vector<2x128xf32>
    %cst_27 = arith.constant dense<0.000000e+00> : vector<2x128xf32>
    %138 = tpu.matmul %136, %6, %cst_27 {dimension_numbers = #tpu.dot_dimension_numbers<[1], [0], [0], [1], [0, 0, 1, 1], [], []>} : vector<2x32xf32>, vector<32x128xf32>, vector<2x128xf32> -> vector<2x128xf32>
    %139 = arith.addf %137, %138 : vector<2x128xf32>
    %140 = arith.negf %139 : vector<2x128xf32>
    %141 = math.exp %140 : vector<2x128xf32>
    %cst_28 = arith.constant 1.000000e+00 : f32
    %142 = vector.broadcast %cst_28 : f32 to vector<2x128xf32>
    %143 = arith.addf %142, %141 : vector<2x128xf32>
    %144 = arith.divf %142, %143 : vector<2x128xf32>
    %145 = math.tanh %139 : vector<2x128xf32>
    %146 = vector.extract_strided_slice %144 {offsets = [0, 0], sizes = [2, 32], strides = [1, 1]} : vector<2x128xf32> to vector<2x32xf32>
    %147 = vector.extract_strided_slice %144 {offsets = [0, 32], sizes = [2, 32], strides = [1, 1]} : vector<2x128xf32> to vector<2x32xf32>
    %148 = vector.extract_strided_slice %145 {offsets = [0, 64], sizes = [2, 32], strides = [1, 1]} : vector<2x128xf32> to vector<2x32xf32>
    %149 = vector.extract_strided_slice %144 {offsets = [0, 96], sizes = [2, 32], strides = [1, 1]} : vector<2x128xf32> to vector<2x32xf32>
    %150 = arith.mulf %147, %134 : vector<2x32xf32>
    %151 = arith.mulf %146, %148 : vector<2x32xf32>
    %152 = arith.addf %150, %151 : vector<2x32xf32>
    %153 = math.tanh %152 : vector<2x32xf32>
    %154 = arith.mulf %149, %153 : vector<2x32xf32>
    %155 = tpu.concatenate %28, %46, %64, %82, %100, %118, %136, %154 in 0 : vector<2x32xf32>, vector<2x32xf32>, vector<2x32xf32>, vector<2x32xf32>, vector<2x32xf32>, vector<2x32xf32>, vector<2x32xf32>, vector<2x32xf32> -> vector<16x32xf32>
    %c0_29 = arith.constant 0 : index
    %c0_30 = arith.constant 0 : index
    %156 = vector.load %arg4[%c0_29, %c0_30] : memref<32x128xf32, #tpu.memory_space<vmem>>, vector<32x128xf32>
    %cst_31 = arith.constant dense<0.000000e+00> : vector<16x128xf32>
    %157 = tpu.matmul %155, %156, %cst_31 {dimension_numbers = #tpu.dot_dimension_numbers<[1], [0], [0], [1], [0, 0, 1, 1], [], []>} : vector<16x32xf32>, vector<32x128xf32>, vector<16x128xf32> -> vector<16x128xf32>
    %c0_32 = arith.constant 0 : index
    %c0_33 = arith.constant 0 : index
    %158 = vector.load %arg6[%c0_32, %c0_33] : memref<1x128xf32, #tpu.memory_space<vmem>>, vector<1x128xf32>
    %159 = vector.broadcast %158 : vector<1x128xf32> to vector<16x128xf32>
    %160 = arith.addf %157, %159 : vector<16x128xf32>
    %c0_34 = arith.constant 0 : index
    %c0_35 = arith.constant 0 : index
    %161 = vector.load %arg5[%c0_34, %c0_35] : memref<32x128xf32, #tpu.memory_space<vmem>>, vector<32x128xf32>
    %c1 = arith.constant 1 : index
    %c0_36 = arith.constant 0 : index
    %c0_37 = arith.constant 0 : index
    %162 = vector.load %arg7[%c1, %c0_36, %c0_37] : memref<2x2x32xf32, #tpu.memory_space<vmem>>, vector<1x2x32xf32>
    %163 = vector.shape_cast %162 : vector<1x2x32xf32> to vector<2x32xf32>
    %c1_38 = arith.constant 1 : index
    %c0_39 = arith.constant 0 : index
    %c0_40 = arith.constant 0 : index
    %164 = vector.load %arg8[%c1_38, %c0_39, %c0_40] : memref<2x2x32xf32, #tpu.memory_space<vmem>>, vector<1x2x32xf32>
    %165 = vector.shape_cast %164 : vector<1x2x32xf32> to vector<2x32xf32>
    %166 = vector.extract_strided_slice %160 {offsets = [0, 0], sizes = [2, 128], strides = [1, 1]} : vector<16x128xf32> to vector<2x128xf32>
    %cst_41 = arith.constant dense<0.000000e+00> : vector<2x128xf32>
    %167 = tpu.matmul %163, %161, %cst_41 {dimension_numbers = #tpu.dot_dimension_numbers<[1], [0], [0], [1], [0, 0, 1, 1], [], []>} : vector<2x32xf32>, vector<32x128xf32>, vector<2x128xf32> -> vector<2x128xf32>
    %168 = arith.addf %166, %167 : vector<2x128xf32>
    %169 = arith.negf %168 : vector<2x128xf32>
    %170 = math.exp %169 : vector<2x128xf32>
    %cst_42 = arith.constant 1.000000e+00 : f32
    %171 = vector.broadcast %cst_42 : f32 to vector<2x128xf32>
    %172 = arith.addf %171, %170 : vector<2x128xf32>
    %173 = arith.divf %171, %172 : vector<2x128xf32>
    %174 = math.tanh %168 : vector<2x128xf32>
    %175 = vector.extract_strided_slice %173 {offsets = [0, 0], sizes = [2, 32], strides = [1, 1]} : vector<2x128xf32> to vector<2x32xf32>
    %176 = vector.extract_strided_slice %173 {offsets = [0, 32], sizes = [2, 32], strides = [1, 1]} : vector<2x128xf32> to vector<2x32xf32>
    %177 = vector.extract_strided_slice %174 {offsets = [0, 64], sizes = [2, 32], strides = [1, 1]} : vector<2x128xf32> to vector<2x32xf32>
    %178 = vector.extract_strided_slice %173 {offsets = [0, 96], sizes = [2, 32], strides = [1, 1]} : vector<2x128xf32> to vector<2x32xf32>
    %179 = arith.mulf %176, %165 : vector<2x32xf32>
    %180 = arith.mulf %175, %177 : vector<2x32xf32>
    %181 = arith.addf %179, %180 : vector<2x32xf32>
    %182 = math.tanh %181 : vector<2x32xf32>
    %183 = arith.mulf %178, %182 : vector<2x32xf32>
    %184 = vector.extract_strided_slice %160 {offsets = [2, 0], sizes = [2, 128], strides = [1, 1]} : vector<16x128xf32> to vector<2x128xf32>
    %cst_43 = arith.constant dense<0.000000e+00> : vector<2x128xf32>
    %185 = tpu.matmul %183, %161, %cst_43 {dimension_numbers = #tpu.dot_dimension_numbers<[1], [0], [0], [1], [0, 0, 1, 1], [], []>} : vector<2x32xf32>, vector<32x128xf32>, vector<2x128xf32> -> vector<2x128xf32>
    %186 = arith.addf %184, %185 : vector<2x128xf32>
    %187 = arith.negf %186 : vector<2x128xf32>
    %188 = math.exp %187 : vector<2x128xf32>
    %cst_44 = arith.constant 1.000000e+00 : f32
    %189 = vector.broadcast %cst_44 : f32 to vector<2x128xf32>
    %190 = arith.addf %189, %188 : vector<2x128xf32>
    %191 = arith.divf %189, %190 : vector<2x128xf32>
    %192 = math.tanh %186 : vector<2x128xf32>
    %193 = vector.extract_strided_slice %191 {offsets = [0, 0], sizes = [2, 32], strides = [1, 1]} : vector<2x128xf32> to vector<2x32xf32>
    %194 = vector.extract_strided_slice %191 {offsets = [0, 32], sizes = [2, 32], strides = [1, 1]} : vector<2x128xf32> to vector<2x32xf32>
    %195 = vector.extract_strided_slice %192 {offsets = [0, 64], sizes = [2, 32], strides = [1, 1]} : vector<2x128xf32> to vector<2x32xf32>
    %196 = vector.extract_strided_slice %191 {offsets = [0, 96], sizes = [2, 32], strides = [1, 1]} : vector<2x128xf32> to vector<2x32xf32>
    %197 = arith.mulf %194, %181 : vector<2x32xf32>
    %198 = arith.mulf %193, %195 : vector<2x32xf32>
    %199 = arith.addf %197, %198 : vector<2x32xf32>
    %200 = math.tanh %199 : vector<2x32xf32>
    %201 = arith.mulf %196, %200 : vector<2x32xf32>
    %202 = vector.extract_strided_slice %160 {offsets = [4, 0], sizes = [2, 128], strides = [1, 1]} : vector<16x128xf32> to vector<2x128xf32>
    %cst_45 = arith.constant dense<0.000000e+00> : vector<2x128xf32>
    %203 = tpu.matmul %201, %161, %cst_45 {dimension_numbers = #tpu.dot_dimension_numbers<[1], [0], [0], [1], [0, 0, 1, 1], [], []>} : vector<2x32xf32>, vector<32x128xf32>, vector<2x128xf32> -> vector<2x128xf32>
    %204 = arith.addf %202, %203 : vector<2x128xf32>
    %205 = arith.negf %204 : vector<2x128xf32>
    %206 = math.exp %205 : vector<2x128xf32>
    %cst_46 = arith.constant 1.000000e+00 : f32
    %207 = vector.broadcast %cst_46 : f32 to vector<2x128xf32>
    %208 = arith.addf %207, %206 : vector<2x128xf32>
    %209 = arith.divf %207, %208 : vector<2x128xf32>
    %210 = math.tanh %204 : vector<2x128xf32>
    %211 = vector.extract_strided_slice %209 {offsets = [0, 0], sizes = [2, 32], strides = [1, 1]} : vector<2x128xf32> to vector<2x32xf32>
    %212 = vector.extract_strided_slice %209 {offsets = [0, 32], sizes = [2, 32], strides = [1, 1]} : vector<2x128xf32> to vector<2x32xf32>
    %213 = vector.extract_strided_slice %210 {offsets = [0, 64], sizes = [2, 32], strides = [1, 1]} : vector<2x128xf32> to vector<2x32xf32>
    %214 = vector.extract_strided_slice %209 {offsets = [0, 96], sizes = [2, 32], strides = [1, 1]} : vector<2x128xf32> to vector<2x32xf32>
    %215 = arith.mulf %212, %199 : vector<2x32xf32>
    %216 = arith.mulf %211, %213 : vector<2x32xf32>
    %217 = arith.addf %215, %216 : vector<2x32xf32>
    %218 = math.tanh %217 : vector<2x32xf32>
    %219 = arith.mulf %214, %218 : vector<2x32xf32>
    %220 = vector.extract_strided_slice %160 {offsets = [6, 0], sizes = [2, 128], strides = [1, 1]} : vector<16x128xf32> to vector<2x128xf32>
    %cst_47 = arith.constant dense<0.000000e+00> : vector<2x128xf32>
    %221 = tpu.matmul %219, %161, %cst_47 {dimension_numbers = #tpu.dot_dimension_numbers<[1], [0], [0], [1], [0, 0, 1, 1], [], []>} : vector<2x32xf32>, vector<32x128xf32>, vector<2x128xf32> -> vector<2x128xf32>
    %222 = arith.addf %220, %221 : vector<2x128xf32>
    %223 = arith.negf %222 : vector<2x128xf32>
    %224 = math.exp %223 : vector<2x128xf32>
    %cst_48 = arith.constant 1.000000e+00 : f32
    %225 = vector.broadcast %cst_48 : f32 to vector<2x128xf32>
    %226 = arith.addf %225, %224 : vector<2x128xf32>
    %227 = arith.divf %225, %226 : vector<2x128xf32>
    %228 = math.tanh %222 : vector<2x128xf32>
    %229 = vector.extract_strided_slice %227 {offsets = [0, 0], sizes = [2, 32], strides = [1, 1]} : vector<2x128xf32> to vector<2x32xf32>
    %230 = vector.extract_strided_slice %227 {offsets = [0, 32], sizes = [2, 32], strides = [1, 1]} : vector<2x128xf32> to vector<2x32xf32>
    %231 = vector.extract_strided_slice %228 {offsets = [0, 64], sizes = [2, 32], strides = [1, 1]} : vector<2x128xf32> to vector<2x32xf32>
    %232 = vector.extract_strided_slice %227 {offsets = [0, 96], sizes = [2, 32], strides = [1, 1]} : vector<2x128xf32> to vector<2x32xf32>
    %233 = arith.mulf %230, %217 : vector<2x32xf32>
    %234 = arith.mulf %229, %231 : vector<2x32xf32>
    %235 = arith.addf %233, %234 : vector<2x32xf32>
    %236 = math.tanh %235 : vector<2x32xf32>
    %237 = arith.mulf %232, %236 : vector<2x32xf32>
    %238 = vector.extract_strided_slice %160 {offsets = [8, 0], sizes = [2, 128], strides = [1, 1]} : vector<16x128xf32> to vector<2x128xf32>
    %cst_49 = arith.constant dense<0.000000e+00> : vector<2x128xf32>
    %239 = tpu.matmul %237, %161, %cst_49 {dimension_numbers = #tpu.dot_dimension_numbers<[1], [0], [0], [1], [0, 0, 1, 1], [], []>} : vector<2x32xf32>, vector<32x128xf32>, vector<2x128xf32> -> vector<2x128xf32>
    %240 = arith.addf %238, %239 : vector<2x128xf32>
    %241 = arith.negf %240 : vector<2x128xf32>
    %242 = math.exp %241 : vector<2x128xf32>
    %cst_50 = arith.constant 1.000000e+00 : f32
    %243 = vector.broadcast %cst_50 : f32 to vector<2x128xf32>
    %244 = arith.addf %243, %242 : vector<2x128xf32>
    %245 = arith.divf %243, %244 : vector<2x128xf32>
    %246 = math.tanh %240 : vector<2x128xf32>
    %247 = vector.extract_strided_slice %245 {offsets = [0, 0], sizes = [2, 32], strides = [1, 1]} : vector<2x128xf32> to vector<2x32xf32>
    %248 = vector.extract_strided_slice %245 {offsets = [0, 32], sizes = [2, 32], strides = [1, 1]} : vector<2x128xf32> to vector<2x32xf32>
    %249 = vector.extract_strided_slice %246 {offsets = [0, 64], sizes = [2, 32], strides = [1, 1]} : vector<2x128xf32> to vector<2x32xf32>
    %250 = vector.extract_strided_slice %245 {offsets = [0, 96], sizes = [2, 32], strides = [1, 1]} : vector<2x128xf32> to vector<2x32xf32>
    %251 = arith.mulf %248, %235 : vector<2x32xf32>
    %252 = arith.mulf %247, %249 : vector<2x32xf32>
    %253 = arith.addf %251, %252 : vector<2x32xf32>
    %254 = math.tanh %253 : vector<2x32xf32>
    %255 = arith.mulf %250, %254 : vector<2x32xf32>
    %256 = vector.extract_strided_slice %160 {offsets = [10, 0], sizes = [2, 128], strides = [1, 1]} : vector<16x128xf32> to vector<2x128xf32>
    %cst_51 = arith.constant dense<0.000000e+00> : vector<2x128xf32>
    %257 = tpu.matmul %255, %161, %cst_51 {dimension_numbers = #tpu.dot_dimension_numbers<[1], [0], [0], [1], [0, 0, 1, 1], [], []>} : vector<2x32xf32>, vector<32x128xf32>, vector<2x128xf32> -> vector<2x128xf32>
    %258 = arith.addf %256, %257 : vector<2x128xf32>
    %259 = arith.negf %258 : vector<2x128xf32>
    %260 = math.exp %259 : vector<2x128xf32>
    %cst_52 = arith.constant 1.000000e+00 : f32
    %261 = vector.broadcast %cst_52 : f32 to vector<2x128xf32>
    %262 = arith.addf %261, %260 : vector<2x128xf32>
    %263 = arith.divf %261, %262 : vector<2x128xf32>
    %264 = math.tanh %258 : vector<2x128xf32>
    %265 = vector.extract_strided_slice %263 {offsets = [0, 0], sizes = [2, 32], strides = [1, 1]} : vector<2x128xf32> to vector<2x32xf32>
    %266 = vector.extract_strided_slice %263 {offsets = [0, 32], sizes = [2, 32], strides = [1, 1]} : vector<2x128xf32> to vector<2x32xf32>
    %267 = vector.extract_strided_slice %264 {offsets = [0, 64], sizes = [2, 32], strides = [1, 1]} : vector<2x128xf32> to vector<2x32xf32>
    %268 = vector.extract_strided_slice %263 {offsets = [0, 96], sizes = [2, 32], strides = [1, 1]} : vector<2x128xf32> to vector<2x32xf32>
    %269 = arith.mulf %266, %253 : vector<2x32xf32>
    %270 = arith.mulf %265, %267 : vector<2x32xf32>
    %271 = arith.addf %269, %270 : vector<2x32xf32>
    %272 = math.tanh %271 : vector<2x32xf32>
    %273 = arith.mulf %268, %272 : vector<2x32xf32>
    %274 = vector.extract_strided_slice %160 {offsets = [12, 0], sizes = [2, 128], strides = [1, 1]} : vector<16x128xf32> to vector<2x128xf32>
    %cst_53 = arith.constant dense<0.000000e+00> : vector<2x128xf32>
    %275 = tpu.matmul %273, %161, %cst_53 {dimension_numbers = #tpu.dot_dimension_numbers<[1], [0], [0], [1], [0, 0, 1, 1], [], []>} : vector<2x32xf32>, vector<32x128xf32>, vector<2x128xf32> -> vector<2x128xf32>
    %276 = arith.addf %274, %275 : vector<2x128xf32>
    %277 = arith.negf %276 : vector<2x128xf32>
    %278 = math.exp %277 : vector<2x128xf32>
    %cst_54 = arith.constant 1.000000e+00 : f32
    %279 = vector.broadcast %cst_54 : f32 to vector<2x128xf32>
    %280 = arith.addf %279, %278 : vector<2x128xf32>
    %281 = arith.divf %279, %280 : vector<2x128xf32>
    %282 = math.tanh %276 : vector<2x128xf32>
    %283 = vector.extract_strided_slice %281 {offsets = [0, 0], sizes = [2, 32], strides = [1, 1]} : vector<2x128xf32> to vector<2x32xf32>
    %284 = vector.extract_strided_slice %281 {offsets = [0, 32], sizes = [2, 32], strides = [1, 1]} : vector<2x128xf32> to vector<2x32xf32>
    %285 = vector.extract_strided_slice %282 {offsets = [0, 64], sizes = [2, 32], strides = [1, 1]} : vector<2x128xf32> to vector<2x32xf32>
    %286 = vector.extract_strided_slice %281 {offsets = [0, 96], sizes = [2, 32], strides = [1, 1]} : vector<2x128xf32> to vector<2x32xf32>
    %287 = arith.mulf %284, %271 : vector<2x32xf32>
    %288 = arith.mulf %283, %285 : vector<2x32xf32>
    %289 = arith.addf %287, %288 : vector<2x32xf32>
    %290 = math.tanh %289 : vector<2x32xf32>
    %291 = arith.mulf %286, %290 : vector<2x32xf32>
    %292 = vector.extract_strided_slice %160 {offsets = [14, 0], sizes = [2, 128], strides = [1, 1]} : vector<16x128xf32> to vector<2x128xf32>
    %cst_55 = arith.constant dense<0.000000e+00> : vector<2x128xf32>
    %293 = tpu.matmul %291, %161, %cst_55 {dimension_numbers = #tpu.dot_dimension_numbers<[1], [0], [0], [1], [0, 0, 1, 1], [], []>} : vector<2x32xf32>, vector<32x128xf32>, vector<2x128xf32> -> vector<2x128xf32>
    %294 = arith.addf %292, %293 : vector<2x128xf32>
    %295 = arith.negf %294 : vector<2x128xf32>
    %296 = math.exp %295 : vector<2x128xf32>
    %cst_56 = arith.constant 1.000000e+00 : f32
    %297 = vector.broadcast %cst_56 : f32 to vector<2x128xf32>
    %298 = arith.addf %297, %296 : vector<2x128xf32>
    %299 = arith.divf %297, %298 : vector<2x128xf32>
    %300 = math.tanh %294 : vector<2x128xf32>
    %301 = vector.extract_strided_slice %299 {offsets = [0, 0], sizes = [2, 32], strides = [1, 1]} : vector<2x128xf32> to vector<2x32xf32>
    %302 = vector.extract_strided_slice %299 {offsets = [0, 32], sizes = [2, 32], strides = [1, 1]} : vector<2x128xf32> to vector<2x32xf32>
    %303 = vector.extract_strided_slice %300 {offsets = [0, 64], sizes = [2, 32], strides = [1, 1]} : vector<2x128xf32> to vector<2x32xf32>
    %304 = vector.extract_strided_slice %299 {offsets = [0, 96], sizes = [2, 32], strides = [1, 1]} : vector<2x128xf32> to vector<2x32xf32>
    %305 = arith.mulf %302, %289 : vector<2x32xf32>
    %306 = arith.mulf %301, %303 : vector<2x32xf32>
    %307 = arith.addf %305, %306 : vector<2x32xf32>
    %308 = math.tanh %307 : vector<2x32xf32>
    %309 = arith.mulf %304, %308 : vector<2x32xf32>
    %310 = tpu.concatenate %183, %201, %219, %237, %255, %273, %291, %309 in 0 : vector<2x32xf32>, vector<2x32xf32>, vector<2x32xf32>, vector<2x32xf32>, vector<2x32xf32>, vector<2x32xf32>, vector<2x32xf32>, vector<2x32xf32> -> vector<16x32xf32>
    %c0_57 = arith.constant 0 : index
    %c0_58 = arith.constant 0 : index
    %311 = vector.load %arg9[%c0_57, %c0_58] : memref<32x32xf32, #tpu.memory_space<vmem>>, vector<32x32xf32>
    %cst_59 = arith.constant dense<0.000000e+00> : vector<16x32xf32>
    %312 = tpu.matmul %310, %311, %cst_59 {dimension_numbers = #tpu.dot_dimension_numbers<[1], [0], [0], [1], [0, 0, 1, 1], [], []>} : vector<16x32xf32>, vector<32x32xf32>, vector<16x32xf32> -> vector<16x32xf32>
    %c0_60 = arith.constant 0 : index
    %c0_61 = arith.constant 0 : index
    %313 = vector.load %arg10[%c0_60, %c0_61] : memref<1x32xf32, #tpu.memory_space<vmem>>, vector<1x32xf32>
    %314 = vector.broadcast %313 : vector<1x32xf32> to vector<16x32xf32>
    %315 = arith.addf %312, %314 : vector<16x32xf32>
    %c0_62 = arith.constant 0 : index
    %c0_63 = arith.constant 0 : index
    %316 = vector.load %arg11[%c0_62, %c0_63] : memref<32x128xf32, #tpu.memory_space<vmem>>, vector<32x128xf32>
    %cst_64 = arith.constant dense<0.000000e+00> : vector<16x128xf32>
    %317 = tpu.matmul %315, %316, %cst_64 {dimension_numbers = #tpu.dot_dimension_numbers<[1], [0], [0], [1], [0, 0, 1, 1], [], []>} : vector<16x32xf32>, vector<32x128xf32>, vector<16x128xf32> -> vector<16x128xf32>
    %c0_65 = arith.constant 0 : index
    %c0_66 = arith.constant 0 : index
    %318 = vector.load %arg12[%c0_65, %c0_66] : memref<1x128xf32, #tpu.memory_space<vmem>>, vector<1x128xf32>
    %319 = vector.broadcast %318 : vector<1x128xf32> to vector<16x128xf32>
    %320 = arith.addf %317, %319 : vector<16x128xf32>
    %c0_67 = arith.constant 0 : index
    %c0_68 = arith.constant 0 : index
    %321 = vector.load %arg13[%c0_67, %c0_68] : memref<16x128xf32, #tpu.memory_space<vmem>>, vector<16x128xf32>
    tpu.vector_store %arg13[%c0_67, %c0_68], %320 {strides = array<i32>} : memref<16x128xf32, #tpu.memory_space<vmem>>, vector<16x128xf32>,
    %c0_69 = arith.constant 0 : index
    %c0_70 = arith.constant 0 : index
    %c0_71 = arith.constant 0 : index
    %322 = vector.load %arg14[%c0_69, %c0_70, %c0_71] : memref<2x2x32xf32, #tpu.memory_space<vmem>>, vector<1x2x32xf32>
    %323 = vector.shape_cast %322 : vector<1x2x32xf32> to vector<2x32xf32>
    %324 = vector.shape_cast %154 : vector<2x32xf32> to vector<1x2x32xf32>
    tpu.vector_store %arg14[%c0_69, %c0_70, %c0_71], %324 {strides = array<i32>} : memref<2x2x32xf32, #tpu.memory_space<vmem>>, vector<1x2x32xf32>,
    %c1_72 = arith.constant 1 : index
    %c0_73 = arith.constant 0 : index
    %c0_74 = arith.constant 0 : index
    %325 = vector.load %arg14[%c1_72, %c0_73, %c0_74] : memref<2x2x32xf32, #tpu.memory_space<vmem>>, vector<1x2x32xf32>
    %326 = vector.shape_cast %325 : vector<1x2x32xf32> to vector<2x32xf32>
    %327 = vector.shape_cast %309 : vector<2x32xf32> to vector<1x2x32xf32>
    tpu.vector_store %arg14[%c1_72, %c0_73, %c0_74], %327 {strides = array<i32>} : memref<2x2x32xf32, #tpu.memory_space<vmem>>, vector<1x2x32xf32>,
    %c0_75 = arith.constant 0 : index
    %c0_76 = arith.constant 0 : index
    %c0_77 = arith.constant 0 : index
    %328 = vector.load %arg15[%c0_75, %c0_76, %c0_77] : memref<2x2x32xf32, #tpu.memory_space<vmem>>, vector<1x2x32xf32>
    %329 = vector.shape_cast %328 : vector<1x2x32xf32> to vector<2x32xf32>
    %330 = vector.shape_cast %152 : vector<2x32xf32> to vector<1x2x32xf32>
    tpu.vector_store %arg15[%c0_75, %c0_76, %c0_77], %330 {strides = array<i32>} : memref<2x2x32xf32, #tpu.memory_space<vmem>>, vector<1x2x32xf32>,
    %c1_78 = arith.constant 1 : index
    %c0_79 = arith.constant 0 : index
    %c0_80 = arith.constant 0 : index
    %331 = vector.load %arg15[%c1_78, %c0_79, %c0_80] : memref<2x2x32xf32, #tpu.memory_space<vmem>>, vector<1x2x32xf32>
    %332 = vector.shape_cast %331 : vector<1x2x32xf32> to vector<2x32xf32>
    %333 = vector.shape_cast %307 : vector<2x32xf32> to vector<1x2x32xf32>
    tpu.vector_store %arg15[%c1_78, %c0_79, %c0_80], %333 {strides = array<i32>} : memref<2x2x32xf32, #tpu.memory_space<vmem>>, vector<1x2x32xf32>,
    return
  }
}

</mosaic_0001>

<bundles_post_ra>
// kernel: covered_lstm_forward.1
= control target key start
LH: loop header
LB: loop body
LE: loop exit
PB: predicated region body
PF: predicated region fallthrough
CT: control target
= control target key end

     0   :  { %21 = vsyncpa [#allocation3], 0  ;;  %s3944_s0 = inlined_call_operand.hbm [shape: f32[16,72], index: 0, kind: input, shape index: {}]   ;;  %s3945_s1 = inlined_call_operand.hbm [shape: f32[72,128], index: 1, kind: input, shape index: {}]   ;;  %s3946_s2 = inlined_call_operand.vmem [shape: f32[32,128], index: 2, kind: input, shape index: {}]   ;;  %s3947_s3 = inlined_call_operand.vmem [shape: f32[1,128], index: 3, kind: input, shape index: {}]   ;;  %s3948_s4 = inlined_call_operand.hbm [shape: f32[32,128], index: 4, kind: input, shape index: {}]   ;;  %s3949_s5 = inlined_call_operand.hbm [shape: f32[32,128], index: 5, kind: input, shape index: {}]   ;;  %s3950_s6 = inlined_call_operand.vmem [shape: f32[1,128], index: 6, kind: input, shape index: {}]   ;;  %s3951_s7 = inlined_call_operand.hbm [shape: f32[2,2,32], index: 7, kind: input, shape index: {}]   ;;  %s3952_s8 = inlined_call_operand.hbm [shape: f32[2,2,32], index: 8, kind: input, shape index: {}]   ;;  %s3953_s9 = inlined_call_operand.hbm [shape: f32[32,32], index: 9, kind: input, shape index: {}]   ;;  %s3954_s10 = inlined_call_operand.hbm [shape: f32[1,32], index: 10, kind: input, shape index: {}]   ;;  %s3955_s11 = inlined_call_operand.hbm [shape: f32[32,128], index: 11, kind: input, shape index: {}]   ;;  %s3956_s12 = inlined_call_operand.hbm [shape: f32[1,128], index: 12, kind: input, shape index: {}]   ;;  %s3957_s13 = inlined_call_operand.hbm [shape: f32[16,128], index: 13, kind: output, shape index: {0}]   ;;  %s3958_s14 = inlined_call_operand.hbm [shape: f32[2,2,32], index: 14, kind: output, shape index: {1}]   ;;  %s3959_s15 = inlined_call_operand.hbm [shape: f32[2,2,32], index: 15, kind: output, shape index: {2}]  }
   0x1   :  { %22 = vsyncpa [#allocation6], 0 }
   0x2   :  { %23 = vsyncpa [#allocation9], 0 }
   0x3   :  { %24 = vsyncpa [#allocation12], 0 }
   0x4   :  { %25 = vsyncpa [#allocation15], 0 }
   0x5   :  { %26 = vsyncpa [#allocation18], 0 }
   0x6   :  { %27 = vsyncpa [#allocation4], 0 }
   0x7   :  { %28 = vsyncpa [#allocation21], 0  ;;  %s3336_s18 = smov [#allocation5]   ;;  %s3337_s20 = smov [#allocation8]  }
   0x8   :  { %s46_s19 = sshll.u32 %s3336_s18, 4  ;;  %s74_s21 = sshll.u32 %s3337_s20, 4  ;;  %s47_s19 = int_to_ptr.vmem [resolvable:$true] %s46_s19  ;;  %s3438_s21 = int_to_ptr.vmem [resolvable:$true] %s74_s21 }
   0x9   :  { %s3034_s24 = scalar_lea.hbm %s3945_s1, 1152 }
   0xa   :  { %p3035_p0 = scmp.ne.s32.totalorder %s3945_s1, %s3034_s24  ;;  %p3038_p1 = scmp.lt.u32.totalorder %s3034_s24, %s3945_s1 }
   0xc   :  { %p3040_p2 = pnand %p3038_p1, %p3035_p0 }
   0xe   :  { %3043 = shalt.err (!%p3040_p2)
}
   0xf   :  { %s3044_s29 = scalar_lea.vmem %s47_s19, 1152  ;;  %p3049_p4 = scmp.lt.s32.totalorder %s47_s19, %s47_s19 }
  0x10   :  { %p3045_p3 = scmp.ne.s32.totalorder %s47_s19, %s3044_s29  ;;  %p3050_p5 = scmp.lt.s32.totalorder %s3044_s29, %s3044_s29 }
  0x12   :  { %p3051_p6 = por %p3050_p5, %p3049_p4 }
  0x14   :  { %p3052_p7 = pnand %p3051_p6, %p3045_p3 }
  0x16   :  { %3055 = shalt.err (!%p3052_p7)
}
  0x17   :  { %s3338_s30 = smov 128   ;;  %s3339_s16 = smov 8  }
  0x18   :  { %52 = dma.hbm_to_vmem [thread:$0]  %s3945_s1, 1152, %s47_s19, [#allocation6], %s3338_s30, %s3338_s30, %s3339_s16  }
  0x19   :  { %s3056_s23 = scalar_lea.hbm %s3949_s5, 512 }
  0x1a   :  { %p3057_p8 = scmp.ne.s32.totalorder %s3949_s5, %s3056_s23  ;;  %p3060_p9 = scmp.lt.u32.totalorder %s3056_s23, %s3949_s5 }
  0x1c   :  { %p3062_p10 = pnand %p3060_p9, %p3057_p8 }
  0x1e   :  { %3065 = shalt.err (!%p3062_p10)
}
  0x1f   :  { %s3066_s28 = scalar_lea.vmem %s3438_s21, 512  ;;  %p3071_p12 = scmp.lt.s32.totalorder %s3438_s21, %s3438_s21 }
  0x20   :  { %p3067_p11 = scmp.ne.s32.totalorder %s3438_s21, %s3066_s28  ;;  %p3072_p13 = scmp.lt.s32.totalorder %s3066_s28, %s3066_s28 }
  0x22   :  { %p3073_p0 = por %p3072_p13, %p3071_p12 }
  0x24   :  { %p3074_p1 = pnand %p3073_p0, %p3067_p11 }
  0x26   :  { %3077 = shalt.err (!%p3074_p1)
}
  0x27   :  { %80 = dma.hbm_to_vmem [thread:$0]  %s3949_s5, 512, %s3438_s21, [#allocation9], %s3338_s30, %s3338_s30, %s3339_s16  }
  0x28   :  { %s3340_s29 = smov [#allocation11]   ;;  %s3341_s18 = smov [#allocation14]  }
  0x29   :  { %s100_s17 = sshll.u32 %s3340_s29, 4  ;;  %s125_s20 = sshll.u32 %s3341_s18, 4  ;;  %s101_s17 = int_to_ptr.vmem [resolvable:$true] %s100_s17  ;;  %s3475_s20 = int_to_ptr.vmem [resolvable:$true] %s125_s20 }
  0x2a   :  { %s3078_s24 = scalar_lea.hbm %s3952_s8, 64 }
  0x2b   :  { %p3079_p2 = scmp.ne.s32.totalorder %s3952_s8, %s3078_s24  ;;  %p3082_p3 = scmp.lt.u32.totalorder %s3078_s24, %s3952_s8 }
  0x2d   :  { %p3084_p4 = pnand %p3082_p3, %p3079_p2 }
  0x2f   :  { %3087 = shalt.err (!%p3084_p4)
}
  0x30   :  { %s3088_s5 = scalar_lea.vmem %s101_s17, 64  ;;  %p3093_p6 = scmp.lt.s32.totalorder %s101_s17, %s101_s17 }
  0x31   :  { %p3089_p5 = scmp.ne.s32.totalorder %s101_s17, %s3088_s5  ;;  %p3094_p7 = scmp.lt.s32.totalorder %s3088_s5, %s3088_s5 }
  0x33   :  { %p3095_p8 = por %p3094_p7, %p3093_p6 }
  0x35   :  { %p3096_p9 = pnand %p3095_p8, %p3089_p5 }
  0x37   :  { %3099 = shalt.err (!%p3096_p9)
}
  0x38   :  { %s3342_s21 = smov 32   ;;  %s3343_s1 = smov 2  }
  0x39   :  { %106 = dma.hbm_to_vmem [thread:$0]  %s3952_s8, 64, %s101_s17, [#allocation12], %s3342_s21, %s3342_s21, %s3343_s1  }
  0x3a   :  { %s3100_s23 = scalar_lea.hbm %s3954_s10, 16 }
  0x3b   :  { %p3101_p10 = scmp.ne.s32.totalorder %s3954_s10, %s3100_s23  ;;  %p3104_p11 = scmp.lt.u32.totalorder %s3100_s23, %s3954_s10 }
  0x3d   :  { %p3106_p12 = pnand %p3104_p11, %p3101_p10 }
  0x3f   :  { %3109 = shalt.err (!%p3106_p12)
}
  0x40   :  { %s3110_s28 = scalar_lea.vmem %s3475_s20, 16  ;;  %s3114_s8 = scalar_lea.vmem %s3475_s20, 32 }
  0x41   :  { %p3111_p13 = scmp.ne.s32.totalorder %s3475_s20, %s3110_s28  ;;  %p3115_p0 = scmp.lt.s32.totalorder %s3475_s20, %s3475_s20 }
  0x42   :  { %p3116_p1 = scmp.lt.s32.totalorder %s3114_s8, %s3110_s28 }
  0x44   :  { %p3117_p2 = por %p3116_p1, %p3115_p0 }
  0x46   :  { %p3118_p3 = pnand %p3117_p2, %p3111_p13 }
  0x48   :  { %3121 = shalt.err (!%p3118_p3)
}
  0x49   :  { %128 = dma.hbm_to_vmem [thread:$0]  %s3954_s10, 16, %s3475_s20, [#allocation15]  }
  0x4a   :  { %s3344_s19 = smov [#allocation2]   ;;  %s3345_s18 = smov [#allocation7]  }
  0x4b   :  { %s34_s29 = sshll.u32 %s3344_s19, 4  ;;  %s62_s22 = sshll.u32 %s3345_s18, 4  ;;  %s35_s29 = int_to_ptr.vmem [resolvable:$true] %s34_s29  ;;  %s3510_s22 = int_to_ptr.vmem [resolvable:$true] %s62_s22 }
  0x4c   :  { %s3122_s25 = scalar_lea.hbm %s3944_s0, 256 }
  0x4d   :  { %p3123_p4 = scmp.ne.s32.totalorder %s3944_s0, %s3122_s25  ;;  %p3126_p5 = scmp.lt.u32.totalorder %s3122_s25, %s3944_s0 }
  0x4f   :  { %p3128_p6 = pnand %p3126_p5, %p3123_p4 }
  0x51   :  { %3131 = shalt.err (!%p3128_p6)
}
  0x52   :  { %s3132_s10 = scalar_lea.vmem %s35_s29, 256  ;;  %p3137_p8 = scmp.lt.s32.totalorder %s35_s29, %s35_s29 }
  0x53   :  { %p3133_p7 = scmp.ne.s32.totalorder %s35_s29, %s3132_s10  ;;  %p3138_p9 = scmp.lt.s32.totalorder %s3132_s10, %s3132_s10 }
  0x55   :  { %p3139_p10 = por %p3138_p9, %p3137_p8 }
  0x57   :  { %p3140_p11 = pnand %p3139_p10, %p3133_p7 }
  0x59   :  { %3143 = shalt.err (!%p3140_p11)
}
  0x5a   :  { %40 = dma.hbm_to_vmem [thread:$0]  %s3944_s0, 256, %s35_s29, [#allocation3], %s3338_s30, %s3338_s30, %s3339_s16  }
  0x5b   :  { %s3144_s18 = scalar_lea.hbm %s3948_s4, 512 }
  0x5c   :  { %p3145_p12 = scmp.ne.s32.totalorder %s3948_s4, %s3144_s18  ;;  %p3148_p13 = scmp.lt.u32.totalorder %s3144_s18, %s3948_s4 }
  0x5e   :  { %p3150_p0 = pnand %p3148_p13, %p3145_p12 }
  0x60   :  { %3153 = shalt.err (!%p3150_p0)
}
  0x61   :  { %s3154_s27 = scalar_lea.vmem %s3510_s22, 512  ;;  %p3159_p2 = scmp.lt.s32.totalorder %s3510_s22, %s3510_s22 }
  0x62   :  { %p3155_p1 = scmp.ne.s32.totalorder %s3510_s22, %s3154_s27  ;;  %p3160_p3 = scmp.lt.s32.totalorder %s3154_s27, %s3154_s27 }
  0x64   :  { %p3161_p4 = por %p3160_p3, %p3159_p2 }
  0x66   :  { %p3162_p5 = pnand %p3161_p4, %p3155_p1 }
  0x68   :  { %3165 = shalt.err (!%p3162_p5)
}
  0x69   :  { %68 = dma.hbm_to_vmem [thread:$0]  %s3948_s4, 512, %s3510_s22, [#allocation6], %s3338_s30, %s3338_s30, %s3339_s16  }
  0x6a   :  { %s3346_s28 = smov [#allocation10]   ;;  %s3347_s10 = smov [#allocation13]  }
  0x6b   :  { %s88_s8 = sshll.u32 %s3346_s28, 4  ;;  %s112_s20 = sshll.u32 %s3347_s10, 4  ;;  %s89_s8 = int_to_ptr.vmem [resolvable:$true] %s88_s8  ;;  %s3547_s20 = int_to_ptr.vmem [resolvable:$true] %s112_s20 }
  0x6c   :  { %s3166_s19 = scalar_lea.hbm %s3951_s7, 64 }
  0x6d   :  { %p3167_p6 = scmp.ne.s32.totalorder %s3951_s7, %s3166_s19  ;;  %p3170_p7 = scmp.lt.u32.totalorder %s3166_s19, %s3951_s7 }
  0x6f   :  { %p3172_p8 = pnand %p3170_p7, %p3167_p6 }
  0x71   :  { %3175 = shalt.err (!%p3172_p8)
}
  0x72   :  { %s3176_s4 = scalar_lea.vmem %s89_s8, 64  ;;  %p3181_p10 = scmp.lt.s32.totalorder %s89_s8, %s89_s8 }
  0x73   :  { %p3177_p9 = scmp.ne.s32.totalorder %s89_s8, %s3176_s4  ;;  %p3182_p11 = scmp.lt.s32.totalorder %s3176_s4, %s3176_s4 }
  0x75   :  { %p3183_p12 = por %p3182_p11, %p3181_p10 }
  0x77   :  { %p3184_p13 = pnand %p3183_p12, %p3177_p9 }
  0x79   :  { %3187 = shalt.err (!%p3184_p13)
}
  0x7a   :  { %94 = dma.hbm_to_vmem [thread:$0]  %s3951_s7, 64, %s89_s8, [#allocation9], %s3342_s21, %s3342_s21, %s3343_s1  }
  0x7b   :  { %s3188_s29 = scalar_lea.hbm %s3953_s9, 512 }
  0x7c   :  { %p3189_p0 = scmp.ne.s32.totalorder %s3953_s9, %s3188_s29  ;;  %p3192_p1 = scmp.lt.u32.totalorder %s3188_s29, %s3953_s9 }
  0x7e   :  { %p3194_p2 = pnand %p3192_p1, %p3189_p0 }
  0x80   :  { %3197 = shalt.err (!%p3194_p2)
}
  0x81   :  { %s3198_s19 = scalar_lea.vmem %s3547_s20, 512  ;;  %p3203_p4 = scmp.lt.s32.totalorder %s3547_s20, %s3547_s20 }
  0x82   :  { %p3199_p3 = scmp.ne.s32.totalorder %s3547_s20, %s3198_s19  ;;  %p3204_p5 = scmp.lt.s32.totalorder %s3198_s19, %s3198_s19 }
  0x84   :  { %p3205_p6 = por %p3204_p5, %p3203_p4 }
  0x86   :  { %p3206_p7 = pnand %p3205_p6, %p3199_p3 }
  0x88   :  { %3209 = shalt.err (!%p3206_p7)
}
  0x89   :  { %118 = dma.hbm_to_vmem [thread:$0]  %s3953_s9, 512, %s3547_s20, [#allocation12], %s3338_s30, %s3338_s30, %s3339_s16  }
  0x8a   :  { %s3348_s18 = smov [#allocation16]   ;;  %s3349_s24 = smov [#allocation17]  }
  0x8b   :  { %s134_s23 = sshll.u32 %s3348_s18, 4  ;;  %s147_s25 = sshll.u32 %s3349_s24, 4  ;;  %s135_s23 = int_to_ptr.vmem [resolvable:$true] %s134_s23  ;;  %s148_s25 = int_to_ptr.vmem [resolvable:$true] %s147_s25 }
  0x8c   :  { %s3210_s26 = scalar_lea.hbm %s3955_s11, 512 }
  0x8d   :  { %p3211_p8 = scmp.ne.s32.totalorder %s3955_s11, %s3210_s26  ;;  %p3214_p9 = scmp.lt.u32.totalorder %s3210_s26, %s3955_s11 }
  0x8f   :  { %p3216_p10 = pnand %p3214_p9, %p3211_p8 }
  0x91   :  { %3219 = shalt.err (!%p3216_p10)
}
  0x92   :  { %s3220_s9 = scalar_lea.vmem %s135_s23, 512  ;;  %p3225_p12 = scmp.lt.s32.totalorder %s135_s23, %s135_s23 }
  0x93   :  { %p3221_p11 = scmp.ne.s32.totalorder %s135_s23, %s3220_s9  ;;  %p3226_p13 = scmp.lt.s32.totalorder %s3220_s9, %s3220_s9 }
  0x95   :  { %p3227_p0 = por %p3226_p13, %p3225_p12 }
  0x97   :  { %p3228_p1 = pnand %p3227_p0, %p3221_p11 }
  0x99   :  { %3231 = shalt.err (!%p3228_p1)
}
  0x9a   :  { %140 = dma.hbm_to_vmem [thread:$0]  %s3955_s11, 512, %s135_s23, [#allocation15], %s3338_s30, %s3338_s30, %s3339_s16  }
  0x9b   :  { %s3232_s19 = scalar_lea.hbm %s3956_s12, 16 }
  0x9c   :  { %p3233_p2 = scmp.ne.s32.totalorder %s3956_s12, %s3232_s19  ;;  %p3236_p3 = scmp.lt.u32.totalorder %s3232_s19, %s3956_s12 }
  0x9e   :  { %p3238_p4 = pnand %p3236_p3, %p3233_p2 }
  0xa0   :  { %3241 = shalt.err (!%p3238_p4)
}
  0xa1   :  { %s3242_s4 = scalar_lea.vmem %s148_s25, 16  ;;  %s3246_s22 = scalar_lea.vmem %s148_s25, 32 }
  0xa2   :  { %p3243_p5 = scmp.ne.s32.totalorder %s148_s25, %s3242_s4  ;;  %p3247_p6 = scmp.lt.s32.totalorder %s148_s25, %s148_s25 }
  0xa3   :  { %p3248_p7 = scmp.lt.s32.totalorder %s3246_s22, %s3242_s4 }
  0xa5   :  { %p3249_p8 = por %p3248_p7, %p3247_p6 }
  0xa7   :  { %p3250_p9 = pnand %p3249_p8, %p3243_p5 }
  0xa9   :  { %3253 = shalt.err (!%p3250_p9)
}
  0xaa   :  { %150 = dma.hbm_to_vmem [thread:$0]  %s3956_s12, 16, %s148_s25, [#allocation18]  }
  0xab   :  { %3320 = dma.done.wait [#allocation3], 256  }
  0xac   :  { %3321 = vsyncadd [#allocation3], 4294967040 }
  0xad   :  { %3322 = dma.done.wait [#allocation6], 1664  }
  0xae   :  { %3323 = vsyncadd [#allocation6], 4294965632 }
  0xaf   :  { %3324 = dma.done.wait [#allocation9], 576  }
  0xb0   :  { %3325 = vsyncadd [#allocation9], 4294966720 }
  0xb1   :  { %3326 = dma.done.wait [#allocation12], 576  }
  0xb2   :  { %3327 = vsyncadd [#allocation12], 4294966720 }
  0xb3   :  { %3328 = dma.done.wait [#allocation15], 528  }
  0xb4   :  { %3329 = vsyncadd [#allocation15], 4294966768 }
  0xb5   :  { %3330 = dma.done.wait [#allocation18], 16  }
  0xb6   :  { %3331 = vsyncadd [#allocation18], 4294967280  ;;  %v3350_v0 = vmov 0.0|0.0   ;;  %vm3351_vm0 = vmmov 0   ;;  %v3352_v1 = vmov 0.0   ;;  %v183_v2 = vld [vmem:[#allocation5] sm:$0xff] }
  0xb7   :  { %2764 = vmatprep.subr.bf16.mxu1 %v3350_v0  ;;  %2547 = vmatprep.mubr.msk.f32.mxu1 %vm3351_vm0, %v3352_v1  ;;  %v184_v3 = vld [vmem:[#allocation5 + $0x8] sm:$0xff]  ;;  %v185_v4 = vld [vmem:[#allocation5 + $0x10] sm:$0xff]  ;;  %v186_v6 = vld [vmem:[#allocation5 + $0x18] sm:$0xff]  ;;  %vm199_vm1 = vcmask 588800   ;;  %vm287_vm2 = vcmask 261120   ;;  %s3353_s10 = smov 64  }
  0xb8   :  { %v2748_v5 = vpack.c.bf16 %v184_v3, %v183_v2  ;;  %v2752_v7 = vpack.c.bf16 %v186_v6, %v185_v4  ;;  %v187_v8 = vld [vmem:[#allocation5 + $0x20] sm:$0xff]  ;;  %v188_v9 = vld [vmem:[#allocation5 + $0x28] sm:$0xff]  ;;  %v281_v10 = vld [vmem:[%s3946_s2] sm:$0xff]  ;;  %vm1134_vm3 = vcmask 1041408   ;;  %vm1136_vm4 = vcmask 1043456   ;;  %s3355_s5 = smov [#allocation20]  }
  0xb9   :  { %v282_v11 = vld [vmem:[%s3946_s2 + $0x8] sm:$0xff]  ;;  %v181_v12 = vld [vmem:[#allocation2] sm:$0xff]  ;;  %v283_v14 = vld [vmem:[%s3946_s2 + $0x10] sm:$0xff]  ;;  %v2756_v16 = vpack.c.bf16 %v188_v9, %v187_v8  ;;  %vm1138_vm5 = vcmask 1045504   ;;  %vm2293_vm6 = vcmask 261126   ;;  %s2329_s19 = sshll.u32 %s3355_s5, 4  ;;  %s2330_s19 = int_to_ptr.vmem [resolvable:$true] %s2329_s19 }
  0xba   :  { %2749 = vmatprep.subr.bf16.mxu0 %v2748_v5  ;;  %v3620_v13 = vpack.c.bf16 %v282_v11, %v281_v10  ;;  %2536 = vmatprep.mubr.msk.f32.mxu0 %vm199_vm1, %v181_v12  ;;  %v284_v15 = vld [vmem:[%s3946_s2 + $0x18] sm:$0xff]  ;;  %v189_v17 = vld [vmem:[#allocation5 + $0x30] sm:$0xff]  ;;  %v190_v18 = vld [vmem:[#allocation5 + $0x38] sm:$0xff]  ;;  %s3254_s7 = scalar_lea.vmem %s2330_s19, 64  ;;  %p3259_p11 = scmp.lt.s32.totalorder %s2330_s19, %s2330_s19 }
  0xbb   :  { %2751 = vmatpush3.bf16.msra.mxu0 %v2748_v5  ;;  %v3630_v19 = vpack.c.bf16 %v284_v15, %v283_v14  ;;  %v2760_v20 = vpack.c.bf16 %v190_v18, %v189_v17  ;;  %v285_v21 = vld [vmem:[#allocation10] sm:$0x3]  ;;  %v191_v22 = vld [vmem:[#allocation5 + $0x40] sm:$0xff]  ;;  %v182_v23 = vld [vmem:[#allocation2 + $0x8] sm:$0xff]  ;;  %p3255_p10 = scmp.ne.s32.totalorder %s2330_s19, %s3254_s7  ;;  %p3260_p12 = scmp.lt.s32.totalorder %s3254_s7, %s3254_s7 }
  0xbc   :  { %2753 = vmatprep.subr.bf16.mxu0 %v2752_v7  ;;  %2766 = vmatpush3.bf16.msra.mxu1 %v3620_v13  ;;  %v2365_v26 = vld [vmem:[%s3947_s3] ss:$0 sm:$0xff]  ;;  %v286_v33 = vld [vmem:[#allocation11] sm:$0x3] }
  0xbd   :  { %2767 = vmatprep.subr.bf16.mxu1 %v3350_v0  ;;  %p3261_p13 = por %p3260_p12, %p3259_p11 }
  0xbf   :  { %2755 = vmatpush3.bf16.msra.mxu0 %v2752_v7  ;;  %p3262_p0 = pnand %p3261_p13, %p3255_p10 }
  0xc0   :  { %2757 = vmatprep.subr.bf16.mxu0 %v2756_v16  ;;  %2769 = vmatpush3.bf16.msra.mxu1 %v3630_v19 }
  0xc1   :  { %2770 = vmatprep.subr.bf16.mxu1 %v3350_v0 }
  0xc3   :  { %2759 = vmatpush3.bf16.msra.mxu0 %v2756_v16  ;;  %2548 = vmatmul.mubr.msk.f32.vlgmr.msra.gmra.mrb[0].mxu1 %vm287_vm2, %v285_v21 }
  0xc4   :  { %2761 = vmatprep.subr.bf16.mxu0 %v2760_v20  ;;  %2772 = vmatpush3.bf16.msra.mxu1 %v3620_v13 }
  0xc5   :  { %2558 = vmatprep.mubr.msk.f32.mxu1 %vm3351_vm0, %v3352_v1  ;;  %2773 = vmatprep.subr.bf16.mxu1 %v3350_v0 }
  0xc7   :  { %2763 = vmatpush3.bf16.msra.mxu0 %v2760_v20 }
  0xc8   :  { %2534 = vmatprep.subr.mxu0 %v191_v22  ;;  %2775 = vmatpush3.bf16.msra.mxu1 %v3630_v19 }
  0xc9   :  { %2776 = vmatprep.subr.bf16.mxu1 %v3350_v0 }
  0xcb   :  { %2535 = vmatpush3.msra.mxu0 %v191_v22 }
  0xcc   :  { %2537 = vmatmul.mubr.msk.f32.vlgmr.msra.gmra.mrb[0].mxu0 %vm199_vm1, %v182_v23  ;;  %2782 = vmatprep.subr.bf16.mxu0 %v3350_v0 }
  0xcd   :  { %2784 = vmatpush3.bf16.msra.mxu0 %v3620_v13  ;;  %2580 = vmatprep.mubr.msk.f32.mxu0 %vm3351_vm0, %v3352_v1 }
  0xce   :  { %2785 = vmatprep.subr.bf16.mxu0 %v3350_v0 }
  0xd1   :  { %2787 = vmatpush3.bf16.msra.mxu0 %v3630_v19 }
  0xd2   :  { %2794 = vmatprep.subr.bf16.mxu0 %v3350_v0 }
 0x196   :  { %v357_v24 = vpop.f32.mrb[0].mxu1 }
 0x197   :  { %v2549_v25 = vpop.f32.mrb[1].mxu1 }
 0x19f   :  { %v2538_v27 = vpop.f32.mrb[0].mxu0 }
 0x1a0   :  { %v3653_v28 = vadd.f32 %v2538_v27, %v2365_v26  ;;  %v272_v29 = vpop.f32.mrb[1].mxu0 }
 0x1a1   :  { %v3655_v30 = vadd.f32 %v2365_v26, %v272_v29 }
 0x1a3   :  { %v361_v31 = vadd.f32 %v357_v24, %v3655_v30 }
 0x1a5   :  { %2906 = vtanh.f32 %v361_v31  ;;  %v2369_v34 = vmul.f32 -1.442695, %v361_v31 }
 0x1a7   :  { %2908 = vpow2.f32 %v2369_v34 }
 0x1af   :  { %v2907_v32 = vpop.eup %2906 }
 0x1b0   :  { %375 = vrot.lane.b32.xlu0 %v2907_v32, %s3353_s10 }
 0x1b1   :  { %v2909_v35 = vpop.eup %2908 }
 0x1b2   :  { %v365_v36 = vadd.f32 1.0, %v2909_v35 }
 0x1b4   :  { %370 = vrot.lane.b32.xlu0 %v286_v33, %s3342_s21  ;;  %2910 = vrcp.f32 %v365_v36 }
 0x1be   :  { %v2911_v37 = vpop.eup %2910 }
 0x222   :  { %v376_v38 = vpop.permute.xlu0 %375 }
 0x223   :  { %v378_v39 = vmul.f32 %v2911_v37, %v376_v38 }
 0x225   :  { %380 = vrot.lane.b32.xlu1 %v378_v39, %s3342_s21 }
 0x226   :  { %v371_v40 = vpop.permute.xlu0 %370 }
 0x227   :  { %v373_v41 = vmul.f32 %v2911_v37, %v371_v40 }
 0x297   :  { %v381_v42 = vpop.permute.xlu1 %380 }
 0x298   :  { %v383_v43 = vadd.f32 %v381_v42, %v373_v41 }
 0x29a   :  { %2912 = vtanh.f32 %v383_v43  ;;  %v477_v59 = vrot.slane %v383_v43, 6 }
 0x2a4   :  { %v2913_v44 = vpop.eup %2912 }
 0x2a5   :  { %386 = vrot.lane.b32.xlu1 %v2913_v44, %s3353_s10 }
 0x317   :  { %v387_v45 = vpop.permute.xlu1 %386 }
 0x318   :  { %v3662_v46 = vmul.f32 %v2911_v37, %v387_v45 }
 0x31a   :  { %391 = vrot.lane.b32.xlu0 %v3662_v46, %s3342_s21 }
 0x38c   :  { %v392_v47 = vpop.permute.xlu0 %391 }
 0x38d   :  { %2559 = vmatmul.mubr.msk.f32.vlgmr.msra.gmra.mrb[2].mxu1 %vm287_vm2, %v392_v47 }
 0x38e   :  { %2778 = vmatpush3.bf16.msra.mxu1 %v3620_v13  ;;  %2569 = vmatprep.mubr.msk.f32.mxu1 %vm3351_vm0, %v3352_v1 }
 0x38f   :  { %2779 = vmatprep.subr.bf16.mxu1 %v3350_v0 }
 0x392   :  { %2781 = vmatpush3.bf16.msra.mxu1 %v3630_v19 }
 0x393   :  { %2788 = vmatprep.subr.bf16.mxu1 %v3350_v0 }
 0x460   :  { %v461_v48 = vpop.f32.mrb[2].mxu1 }
 0x461   :  { %v466_v49 = vrot.slane %v461_v48, 6  ;;  %v2560_v50 = vpop.f32.mrb[3].mxu1 }
 0x463   :  { %v468_v51 = vadd.f32 %v466_v49, %v3655_v30 }
 0x465   :  { %2914 = vtanh.f32 %v468_v51  ;;  %v2371_v53 = vmul.f32 -1.442695, %v468_v51 }
 0x467   :  { %2916 = vpow2.f32 %v2371_v53 }
 0x46f   :  { %v2915_v52 = vpop.eup %2914 }
 0x470   :  { %481 = vrot.lane.b32.xlu1 %v2915_v52, %s3353_s10 }
 0x471   :  { %v2917_v54 = vpop.eup %2916 }
 0x472   :  { %v472_v55 = vadd.f32 1.0, %v2917_v54 }
 0x474   :  { %2918 = vrcp.f32 %v472_v55 }
 0x47e   :  { %v2919_v56 = vpop.eup %2918 }
 0x47f   :  { %v479_v60 = vmul.f32 %v2919_v56, %v477_v59 }
 0x4e2   :  { %v482_v57 = vpop.permute.xlu1 %481 }
 0x4e3   :  { %v484_v58 = vmul.f32 %v2919_v56, %v482_v57 }
 0x4e5   :  { %486 = vrot.lane.b32.xlu0 %v484_v58, %s3342_s21 }
 0x557   :  { %v487_v61 = vpop.permute.xlu0 %486 }
 0x558   :  { %v489_v62 = vadd.f32 %v487_v61, %v479_v60 }
 0x55a   :  { %2920 = vtanh.f32 %v489_v62  ;;  %v584_v18 = vrot.slane %v489_v62, 6 }
 0x564   :  { %v2921_v63 = vpop.eup %2920 }
 0x565   :  { %492 = vrot.lane.b32.xlu1 %v2921_v63, %s3353_s10 }
 0x5d7   :  { %v493_v2 = vpop.permute.xlu1 %492 }
 0x5d8   :  { %v495_v3 = vmul.f32 %v2919_v56, %v493_v2 }
 0x5da   :  { %v497_v4 = vrot.slane %v495_v3, 2  ;;  %v1135_v26 = vsel %vm1134_vm3, %v3662_v46, %v495_v3 }
 0x5dc   :  { %498 = vrot.lane.b32.xlu0 %v497_v4, %s3342_s21 }
 0x64e   :  { %v499_v5 = vpop.permute.xlu0 %498 }
 0x64f   :  { %2570 = vmatmul.mubr.msk.f32.vlgmr.msra.gmra.mrb[4].mxu1 %vm287_vm2, %v499_v5 }
 0x650   :  { %2790 = vmatpush3.bf16.msra.mxu1 %v3620_v13  ;;  %2591 = vmatprep.mubr.msk.f32.mxu1 %vm3351_vm0, %v3352_v1 }
 0x651   :  { %2791 = vmatprep.subr.bf16.mxu1 %v3350_v0 }
 0x654   :  { %2793 = vmatpush3.bf16.msra.mxu1 %v3630_v19 }
 0x655   :  { %2800 = vmatprep.subr.bf16.mxu1 %v3350_v0 }
 0x722   :  { %v568_v6 = vpop.f32.mrb[4].mxu1 }
 0x723   :  { %v573_v7 = vrot.slane %v568_v6, 4  ;;  %v2571_v8 = vpop.f32.mrb[5].mxu1 }
 0x725   :  { %v575_v9 = vadd.f32 %v573_v7, %v3655_v30 }
 0x727   :  { %2922 = vtanh.f32 %v575_v9  ;;  %v2373_v11 = vmul.f32 -1.442695, %v575_v9 }
 0x729   :  { %2924 = vpow2.f32 %v2373_v11 }
 0x731   :  { %v2923_v10 = vpop.eup %2922 }
 0x732   :  { %588 = vrot.lane.b32.xlu1 %v2923_v10, %s3353_s10 }
 0x733   :  { %v2925_v12 = vpop.eup %2924 }
 0x734   :  { %v579_v14 = vadd.f32 1.0, %v2925_v12 }
 0x736   :  { %2926 = vrcp.f32 %v579_v14 }
 0x740   :  { %v2927_v15 = vpop.eup %2926 }
 0x741   :  { %v586_v20 = vmul.f32 %v2927_v15, %v584_v18 }
 0x7a4   :  { %v589_v16 = vpop.permute.xlu1 %588 }
 0x7a5   :  { %v591_v17 = vmul.f32 %v2927_v15, %v589_v16 }
 0x7a7   :  { %593 = vrot.lane.b32.xlu0 %v591_v17, %s3342_s21 }
 0x819   :  { %v594_v21 = vpop.permute.xlu0 %593 }
 0x81a   :  { %v596_v22 = vadd.f32 %v594_v21, %v586_v20 }
 0x81c   :  { %2928 = vtanh.f32 %v596_v22  ;;  %v691_v43 = vrot.slane %v596_v22, 6 }
 0x826   :  { %v2929_v23 = vpop.eup %2928 }
 0x827   :  { %599 = vrot.lane.b32.xlu1 %v2929_v23, %s3353_s10 }
 0x899   :  { %v600_v24 = vpop.permute.xlu1 %599 }
 0x89a   :  { %v602_v25 = vmul.f32 %v2927_v15, %v600_v24 }
 0x89c   :  { %v604_v27 = vrot.slane %v602_v25, 4  ;;  %v1137_v29 = vsel %vm1136_vm4, %v1135_v26, %v602_v25 }
 0x89e   :  { %605 = vrot.lane.b32.xlu0 %v604_v27, %s3342_s21 }
 0x910   :  { %v606_v31 = vpop.permute.xlu0 %605 }
 0x911   :  { %2581 = vmatmul.mubr.msk.f32.vlgmr.msra.gmra.mrb[2].mxu0 %vm287_vm2, %v606_v31 }
 0x912   :  { %2796 = vmatpush3.bf16.msra.mxu0 %v3620_v13  ;;  %2602 = vmatprep.mubr.msk.f32.mxu0 %vm3351_vm0, %v3352_v1 }
 0x913   :  { %2797 = vmatprep.subr.bf16.mxu0 %v3350_v0 }
 0x916   :  { %2799 = vmatpush3.bf16.msra.mxu0 %v3630_v19 }
 0x917   :  { %2806 = vmatprep.subr.bf16.mxu0 %v3350_v0 }
 0x9e4   :  { %v675_v32 = vpop.f32.mrb[2].mxu0 }
 0x9e5   :  { %v680_v33 = vrot.slane %v675_v32, 2  ;;  %v2582_v34 = vpop.f32.mrb[3].mxu0 }
 0x9e7   :  { %v682_v35 = vadd.f32 %v680_v33, %v3655_v30 }
 0x9e9   :  { %2930 = vtanh.f32 %v682_v35  ;;  %v2375_v37 = vmul.f32 -1.442695, %v682_v35 }
 0x9eb   :  { %2932 = vpow2.f32 %v2375_v37 }
 0x9f3   :  { %v2931_v36 = vpop.eup %2930 }
 0x9f4   :  { %695 = vrot.lane.b32.xlu1 %v2931_v36, %s3353_s10 }
 0x9f5   :  { %v2933_v38 = vpop.eup %2932 }
 0x9f6   :  { %v686_v39 = vadd.f32 1.0, %v2933_v38 }
 0x9f8   :  { %2934 = vrcp.f32 %v686_v39 }
 0xa02   :  { %v2935_v40 = vpop.eup %2934 }
 0xa03   :  { %v693_v44 = vmul.f32 %v2935_v40, %v691_v43 }
 0xa66   :  { %v696_v41 = vpop.permute.xlu1 %695 }
 0xa67   :  { %v698_v42 = vmul.f32 %v2935_v40, %v696_v41 }
 0xa69   :  { %700 = vrot.lane.b32.xlu0 %v698_v42, %s3342_s21 }
 0xadb   :  { %v701_v45 = vpop.permute.xlu0 %700 }
 0xadc   :  { %v703_v46 = vadd.f32 %v701_v45, %v693_v44 }
 0xade   :  { %2936 = vtanh.f32 %v703_v46  ;;  %v795_v62 = vrot.slane %v703_v46, 6 }
 0xae8   :  { %v2937_v30 = vpop.eup %2936 }
 0xae9   :  { %706 = vrot.lane.b32.xlu1 %v2937_v30, %s3353_s10 }
 0xb5b   :  { %v707_v47 = vpop.permute.xlu1 %706 }
 0xb5c   :  { %v709_v48 = vmul.f32 %v2935_v40, %v707_v47 }
 0xb5e   :  { %v711_v49 = vrot.slane %v709_v48, 6  ;;  %v3705_v50 = vsel %vm1138_vm5, %v1137_v29, %v709_v48 }
 0xb60   :  { %712 = vrot.lane.b32.xlu0 %v711_v49, %s3342_s21 }
 0xbd2   :  { %v713_v51 = vpop.permute.xlu0 %712 }
 0xbd3   :  { %2592 = vmatmul.mubr.msk.f32.vlgmr.msra.gmra.mrb[6].mxu1 %vm287_vm2, %v713_v51 }
 0xbd4   :  { %2802 = vmatpush3.bf16.msra.mxu1 %v3620_v13  ;;  %2613 = vmatprep.mubr.msk.f32.mxu1 %vm3351_vm0, %v3352_v1 }
 0xbd5   :  { %2803 = vmatprep.subr.bf16.mxu1 %v3350_v0 }
 0xbd8   :  { %2805 = vmatpush3.bf16.msra.mxu1 %v3630_v19 }
 0xca6   :  { %v782_v52 = vpop.f32.mrb[6].mxu1 }
 0xca7   :  { %v786_v53 = vadd.f32 %v782_v52, %v3653_v28  ;;  %v2593_v54 = vpop.f32.mrb[7].mxu1 }
 0xca9   :  { %2938 = vtanh.f32 %v786_v53  ;;  %v2377_v56 = vmul.f32 -1.442695, %v786_v53 }
 0xcab   :  { %2940 = vpow2.f32 %v2377_v56 }
 0xcb3   :  { %v2939_v55 = vpop.eup %2938 }
 0xcb4   :  { %799 = vrot.lane.b32.xlu1 %v2939_v55, %s3353_s10 }
 0xcb5   :  { %v2941_v57 = vpop.eup %2940 }
 0xcb6   :  { %v790_v58 = vadd.f32 1.0, %v2941_v57 }
 0xcb8   :  { %2942 = vrcp.f32 %v790_v58 }
 0xcc2   :  { %v2943_v59 = vpop.eup %2942 }
 0xcc3   :  { %v797_v63 = vmul.f32 %v2943_v59, %v795_v62 }
 0xd26   :  { %v800_v60 = vpop.permute.xlu1 %799 }
 0xd27   :  { %v802_v61 = vmul.f32 %v2943_v59, %v800_v60 }
 0xd29   :  { %804 = vrot.lane.b32.xlu0 %v802_v61, %s3342_s21 }
 0xd9b   :  { %v805_v2 = vpop.permute.xlu0 %804 }
 0xd9c   :  { %v807_v3 = vadd.f32 %v805_v2, %v797_v63 }
 0xd9e   :  { %2944 = vtanh.f32 %v807_v3 }
 0xda8   :  { %v2945_v4 = vpop.eup %2944 }
 0xda9   :  { %810 = vrot.lane.b32.xlu1 %v2945_v4, %s3353_s10 }
 0xe1b   :  { %v811_v5 = vpop.permute.xlu1 %810 }
 0xe1c   :  { %v3718_v6 = vmul.f32 %v2943_v59, %v811_v5  ;;  %v1143_v5 = vld [vmem:[#allocation7] sm:$0xff] }
 0xe1e   :  { %815 = vrot.lane.b32.xlu0 %v3718_v6, %s3342_s21 }
 0xe90   :  { %v816_v7 = vpop.permute.xlu0 %815 }
 0xe91   :  { %2603 = vmatmul.mubr.msk.f32.vlgmr.msra.gmra.mrb[4].mxu0 %vm287_vm2, %v816_v7  ;;  %v1239_v7 = vld [vmem:[#allocation8] sm:$0xff] }
 0xe92   :  { %2808 = vmatpush3.bf16.msra.mxu0 %v3620_v13  ;;  %2624 = vmatprep.mubr.msk.f32.mxu0 %vm3351_vm0, %v3352_v1 }
 0xe93   :  { %2809 = vmatprep.subr.bf16.mxu0 %v3350_v0 }
 0xe96   :  { %2811 = vmatpush3.bf16.msra.mxu0 %v3630_v19  ;;  %v901_v19 = vrot.slane %v807_v3, 6 }
 0xe97   :  { %2820 = vmatprep.subr.bf16.mxu0 %v3350_v0 }
 0xf64   :  { %v885_v8 = vpop.f32.mrb[4].mxu0 }
 0xf65   :  { %v890_v9 = vrot.slane %v885_v8, 6  ;;  %v2604_v10 = vpop.f32.mrb[5].mxu0 }
 0xf66   :  { %v1145_v10 = vld [vmem:[#allocation7 + $0x10] sm:$0xff] }
 0xf67   :  { %v892_v11 = vadd.f32 %v890_v9, %v3653_v28  ;;  %v1240_v9 = vld [vmem:[#allocation8 + $0x8] sm:$0xff] }
 0xf69   :  { %2946 = vtanh.f32 %v892_v11  ;;  %v2379_v14 = vmul.f32 -1.442695, %v892_v11  ;;  %v1146_v11 = vld [vmem:[#allocation7 + $0x18] sm:$0xff] }
 0xf6b   :  { %2948 = vpow2.f32 %v2379_v14  ;;  %v1241_v14 = vld [vmem:[#allocation8 + $0x10] sm:$0xff] }
 0xf73   :  { %v2947_v12 = vpop.eup %2946 }
 0xf74   :  { %905 = vrot.lane.b32.xlu1 %v2947_v12, %s3353_s10  ;;  %v3755_v12 = vpack.c.bf16 %v1240_v9, %v1239_v7 }
 0xf75   :  { %v2949_v13 = vpop.eup %2948 }
 0xf76   :  { %v896_v15 = vadd.f32 1.0, %v2949_v13  ;;  %v1242_v13 = vld [vmem:[#allocation8 + $0x18] sm:$0xff] }
 0xf78   :  { %2950 = vrcp.f32 %v896_v15  ;;  %v3758_v15 = vpack.c.bf16 %v1242_v13, %v1241_v14 }
 0xf82   :  { %v2951_v16 = vpop.eup %2950 }
 0xf83   :  { %v903_v20 = vmul.f32 %v2951_v16, %v901_v19 }
 0xfe6   :  { %v906_v17 = vpop.permute.xlu1 %905 }
 0xfe7   :  { %v908_v18 = vmul.f32 %v2951_v16, %v906_v17  ;;  %v1244_v17 = vld [vmem:[#allocation10 + $0x2] sm:$0x3] }
 0xfe9   :  { %910 = vrot.lane.b32.xlu0 %v908_v18, %s3342_s21 }
0x105b   :  { %v911_v21 = vpop.permute.xlu0 %910 }
0x105c   :  { %v913_v22 = vadd.f32 %v911_v21, %v903_v20  ;;  %v1246_v21 = vld [vmem:[#allocation11 + $0x2] sm:$0x3] }
0x105e   :  { %2952 = vtanh.f32 %v913_v22  ;;  %v1008_v41 = vrot.slane %v913_v22, 6 }
0x1068   :  { %v2953_v23 = vpop.eup %2952 }
0x1069   :  { %916 = vrot.lane.b32.xlu1 %v2953_v23, %s3353_s10 }
0x10db   :  { %v917_v24 = vpop.permute.xlu1 %916 }
0x10dc   :  { %v919_v25 = vmul.f32 %v2951_v16, %v917_v24 }
0x10de   :  { %v921_v26 = vrot.slane %v919_v25, 2  ;;  %v1140_v47 = vsel %vm1134_vm3, %v3718_v6, %v919_v25  ;;  %v1144_v6 = vld [vmem:[#allocation7 + $0x8] sm:$0xff] }
0x10df   :  { %v2812_v8 = vpack.c.bf16 %v1144_v6, %v1143_v5  ;;  %v2384_v25 = vld [vmem:[%s3950_s6] ss:$0 sm:$0xff]  ;;  %s3354_s6 = smov 96  }
0x10e0   :  { %922 = vrot.lane.b32.xlu0 %v921_v26, %s3342_s21 }
0x10e1   :  { %2813 = vmatprep.subr.bf16.mxu1 %v2812_v8 }
0x1152   :  { %v923_v27 = vpop.permute.xlu0 %922 }
0x1153   :  { %2614 = vmatmul.mubr.msk.f32.vlgmr.msra.gmra.mrb[8].mxu1 %vm287_vm2, %v923_v27 }
0x1154   :  { %2815 = vmatpush3.bf16.msra.mxu1 %v2812_v8 }
0x1226   :  { %v992_v29 = vpop.f32.mrb[8].mxu1 }
0x1227   :  { %v997_v31 = vrot.slane %v992_v29, 4  ;;  %v2615_v32 = vpop.f32.mrb[9].mxu1 }
0x1229   :  { %v999_v33 = vadd.f32 %v997_v31, %v3653_v28 }
0x122b   :  { %2954 = vtanh.f32 %v999_v33  ;;  %v2381_v35 = vmul.f32 -1.442695, %v999_v33 }
0x122d   :  { %2956 = vpow2.f32 %v2381_v35 }
0x1235   :  { %v2955_v34 = vpop.eup %2954 }
0x1236   :  { %1012 = vrot.lane.b32.xlu1 %v2955_v34, %s3353_s10 }
0x1237   :  { %v2957_v36 = vpop.eup %2956 }
0x1238   :  { %v1003_v37 = vadd.f32 1.0, %v2957_v36 }
0x123a   :  { %2958 = vrcp.f32 %v1003_v37 }
0x1244   :  { %v2959_v38 = vpop.eup %2958 }
0x1245   :  { %v1010_v42 = vmul.f32 %v2959_v38, %v1008_v41 }
0x12a8   :  { %v1013_v39 = vpop.permute.xlu1 %1012 }
0x12a9   :  { %v1015_v40 = vmul.f32 %v2959_v38, %v1013_v39 }
0x12ab   :  { %1017 = vrot.lane.b32.xlu0 %v1015_v40, %s3342_s21 }
0x131d   :  { %v1018_v43 = vpop.permute.xlu0 %1017 }
0x131e   :  { %v1020_v44 = vadd.f32 %v1018_v43, %v1010_v42 }
0x1320   :  { %2960 = vtanh.f32 %v1020_v44  ;;  %v1115_v63 = vrot.slane %v1020_v44, 6 }
0x132a   :  { %v2961_v45 = vpop.eup %2960 }
0x132b   :  { %1023 = vrot.lane.b32.xlu1 %v2961_v45, %s3353_s10 }
0x139d   :  { %v1024_v46 = vpop.permute.xlu1 %1023 }
0x139e   :  { %v1026_v30 = vmul.f32 %v2959_v38, %v1024_v46 }
0x13a0   :  { %v1028_v48 = vrot.slane %v1026_v30, 4  ;;  %v1141_v49 = vsel %vm1136_vm4, %v1140_v47, %v1026_v30 }
0x13a2   :  { %1029 = vrot.lane.b32.xlu0 %v1028_v48, %s3342_s21 }
0x1414   :  { %v1030_v51 = vpop.permute.xlu0 %1029 }
0x1415   :  { %2625 = vmatmul.mubr.msk.f32.vlgmr.msra.gmra.mrb[6].mxu0 %vm287_vm2, %v1030_v51 }
0x1416   :  { %2646 = vmatprep.mubr.msk.f32.mxu0 %vm3351_vm0, %v3352_v1  ;;  %2822 = vmatpush3.bf16.msra.mxu0 %v3755_v12 }
0x1417   :  { %2823 = vmatprep.subr.bf16.mxu0 %v3350_v0 }
0x141a   :  { %2825 = vmatpush3.bf16.msra.mxu0 %v3758_v15 }
0x141b   :  { %2832 = vmatprep.subr.bf16.mxu0 %v3350_v0 }
0x141d   :  { %2647 = vmatmul.mubr.msk.f32.vlgmr.msra.gmra.mrb[8].mxu0 %vm287_vm2, %v1244_v17 }
0x141e   :  { %2834 = vmatpush3.bf16.msra.mxu0 %v3755_v12  ;;  %2668 = vmatprep.mubr.msk.f32.mxu0 %vm3351_vm0, %v3352_v1 }
0x141f   :  { %2835 = vmatprep.subr.bf16.mxu0 %v3350_v0 }
0x1422   :  { %2837 = vmatpush3.bf16.msra.mxu0 %v3758_v15 }
0x1423   :  { %2844 = vmatprep.subr.bf16.mxu0 %v3350_v0 }
0x14e8   :  { %v1099_v52 = vpop.f32.mrb[6].mxu0 }
0x14e9   :  { %v1104_v53 = vrot.slane %v1099_v52, 2  ;;  %v2626_v54 = vpop.f32.mrb[7].mxu0 }
0x14eb   :  { %v1106_v55 = vadd.f32 %v1104_v53, %v3653_v28 }
0x14ed   :  { %2962 = vtanh.f32 %v1106_v55  ;;  %v2383_v57 = vmul.f32 -1.442695, %v1106_v55 }
0x14ef   :  { %2964 = vpow2.f32 %v2383_v57 }
0x14f0   :  { %v1316_v23 = vpop.f32.mrb[8].mxu0 }
0x14f1   :  { %v2648_v24 = vpop.f32.mrb[9].mxu0 }
0x14f7   :  { %v2963_v56 = vpop.eup %2962 }
0x14f8   :  { %1119 = vrot.lane.b32.xlu1 %v2963_v56, %s3353_s10 }
0x14f9   :  { %v2965_v58 = vpop.eup %2964 }
0x14fa   :  { %v1110_v59 = vadd.f32 1.0, %v2965_v58 }
0x14fc   :  { %2966 = vrcp.f32 %v1110_v59 }
0x1506   :  { %v2967_v60 = vpop.eup %2966 }
0x1507   :  { %v1117_v2 = vmul.f32 %v2967_v60, %v1115_v63 }
0x156a   :  { %v1120_v61 = vpop.permute.xlu1 %1119 }
0x156b   :  { %v1122_v62 = vmul.f32 %v2967_v60, %v1120_v61 }
0x156d   :  { %1124 = vrot.lane.b32.xlu0 %v1122_v62, %s3342_s21 }
0x1571   :  { %1156 = vrot.lane.b32.xlu0 %v3705_v50, %s3342_s21  ;;  %v2816_v50 = vpack.c.bf16 %v1146_v11, %v1145_v10 }
0x1573   :  { %2817 = vmatprep.subr.bf16.mxu1 %v2816_v50 }
0x1574   :  { %2819 = vmatpush3.bf16.msra.mxu1 %v2816_v50 }
0x1575   :  { %2826 = vmatprep.subr.bf16.mxu1 %v3350_v0 }
0x15df   :  { %v1125_v28 = vpop.permute.xlu0 %1124 }
0x15e0   :  { %v3751_v3 = vadd.f32 %v1125_v28, %v1117_v2 }
0x15e2   :  { %2968 = vtanh.f32 %v3751_v3 }
0x15e3   :  { %v1157_v4 = vpop.permute.xlu0 %1156 }
0x15e4   :  { %2635 = vmatprep.mubr.msk.f32.mxu1 %vm287_vm2, %v1157_v4 }
0x15ec   :  { %v2969_v16 = vpop.eup %2968 }
0x15ed   :  { %1130 = vrot.lane.b32.xlu1 %v2969_v16, %s3353_s10 }
0x165f   :  { %v1131_v18 = vpop.permute.xlu1 %1130 }
0x1660   :  { %v3772_v19 = vmul.f32 %v2967_v60, %v1131_v18 }
0x1662   :  { %v1142_v20 = vsel %vm1138_vm5, %v1141_v49, %v3772_v19 }
0x1663   :  { %1158 = vrot.lane.b32.xlu1 %v1142_v20, %s3342_s21 }
0x1667   :  { %1329 = vrot.lane.b32.xlu1 %v1246_v21, %s3342_s21 }
0x16d5   :  { %v1159_v22 = vpop.permute.xlu1 %1158 }
0x16d6   :  { %2636 = vmatmul.mubr.msk.f32.vlgmr.msra.gmra.mrb[10].mxu1 %vm287_vm2, %v1159_v22 }
0x16d7   :  { %2828 = vmatpush3.bf16.msra.mxu1 %v3755_v12  ;;  %2657 = vmatprep.mubr.msk.f32.mxu1 %vm3351_vm0, %v3352_v1 }
0x16d8   :  { %2829 = vmatprep.subr.bf16.mxu1 %v3350_v0 }
0x16d9   :  { %v1330_v40 = vpop.permute.xlu1 %1329 }
0x16db   :  { %2831 = vmatpush3.bf16.msra.mxu1 %v3758_v15 }
0x16dc   :  { %2838 = vmatprep.subr.bf16.mxu1 %v3350_v0 }
0x17a9   :  { %v2637_v26 = vpop.f32.mrb[10].mxu1 }
0x17aa   :  { %v3788_v27 = vadd.f32 %v2637_v26, %v2384_v25  ;;  %v1230_v29 = vpop.f32.mrb[11].mxu1 }
0x17ab   :  { %v3790_v31 = vadd.f32 %v2384_v25, %v1230_v29 }
0x17ad   :  { %v1320_v32 = vadd.f32 %v1316_v23, %v3790_v31 }
0x17af   :  { %2970 = vtanh.f32 %v1320_v32  ;;  %v2388_v34 = vmul.f32 -1.442695, %v1320_v32 }
0x17b1   :  { %2972 = vpow2.f32 %v2388_v34 }
0x17b9   :  { %v2971_v33 = vpop.eup %2970 }
0x17ba   :  { %1334 = vrot.lane.b32.xlu0 %v2971_v33, %s3353_s10 }
0x17bb   :  { %v2973_v35 = vpop.eup %2972 }
0x17bc   :  { %v1324_v36 = vadd.f32 1.0, %v2973_v35 }
0x17be   :  { %2974 = vrcp.f32 %v1324_v36 }
0x17c8   :  { %v2975_v37 = vpop.eup %2974 }
0x17c9   :  { %v1332_v41 = vmul.f32 %v2975_v37, %v1330_v40 }
0x182c   :  { %v1335_v38 = vpop.permute.xlu0 %1334 }
0x182d   :  { %v1337_v39 = vmul.f32 %v2975_v37, %v1335_v38 }
0x182f   :  { %1339 = vrot.lane.b32.xlu0 %v1337_v39, %s3342_s21 }
0x18a1   :  { %v1340_v42 = vpop.permute.xlu0 %1339 }
0x18a2   :  { %v1342_v43 = vadd.f32 %v1340_v42, %v1332_v41 }
0x18a4   :  { %2976 = vtanh.f32 %v1342_v43  ;;  %v1436_v59 = vrot.slane %v1342_v43, 6 }
0x18ae   :  { %v2977_v44 = vpop.eup %2976 }
0x18af   :  { %1345 = vrot.lane.b32.xlu1 %v2977_v44, %s3353_s10 }
0x1921   :  { %v1346_v45 = vpop.permute.xlu1 %1345 }
0x1922   :  { %v3796_v46 = vmul.f32 %v2975_v37, %v1346_v45 }
0x1924   :  { %1350 = vrot.lane.b32.xlu0 %v3796_v46, %s3342_s21 }
0x1996   :  { %v1351_v30 = vpop.permute.xlu0 %1350 }
0x1997   :  { %2658 = vmatmul.mubr.msk.f32.vlgmr.msra.gmra.mrb[12].mxu1 %vm287_vm2, %v1351_v30 }
0x1998   :  { %2840 = vmatpush3.bf16.msra.mxu1 %v3755_v12  ;;  %2679 = vmatprep.mubr.msk.f32.mxu1 %vm3351_vm0, %v3352_v1 }
0x1999   :  { %2841 = vmatprep.subr.bf16.mxu1 %v3350_v0 }
0x199c   :  { %2843 = vmatpush3.bf16.msra.mxu1 %v3758_v15 }
0x199d   :  { %2850 = vmatprep.subr.bf16.mxu1 %v3350_v0 }
0x1a6a   :  { %v1420_v47 = vpop.f32.mrb[12].mxu1 }
0x1a6b   :  { %v1425_v48 = vrot.slane %v1420_v47, 6  ;;  %v2659_v49 = vpop.f32.mrb[13].mxu1 }
0x1a6d   :  { %v1427_v51 = vadd.f32 %v1425_v48, %v3790_v31 }
0x1a6f   :  { %2978 = vtanh.f32 %v1427_v51  ;;  %v2390_v53 = vmul.f32 -1.442695, %v1427_v51 }
0x1a71   :  { %2980 = vpow2.f32 %v2390_v53 }
0x1a79   :  { %v2979_v52 = vpop.eup %2978 }
0x1a7a   :  { %1440 = vrot.lane.b32.xlu1 %v2979_v52, %s3353_s10 }
0x1a7b   :  { %v2981_v54 = vpop.eup %2980 }
0x1a7c   :  { %v1431_v55 = vadd.f32 1.0, %v2981_v54 }
0x1a7e   :  { %2982 = vrcp.f32 %v1431_v55 }
0x1a88   :  { %v2983_v56 = vpop.eup %2982 }
0x1a89   :  { %v1438_v60 = vmul.f32 %v2983_v56, %v1436_v59 }
0x1aec   :  { %v1441_v57 = vpop.permute.xlu1 %1440 }
0x1aed   :  { %v1443_v58 = vmul.f32 %v2983_v56, %v1441_v57 }
0x1aef   :  { %1445 = vrot.lane.b32.xlu0 %v1443_v58, %s3342_s21 }
0x1b61   :  { %v1446_v61 = vpop.permute.xlu0 %1445 }
0x1b62   :  { %v1448_v62 = vadd.f32 %v1446_v61, %v1438_v60 }
0x1b64   :  { %2984 = vtanh.f32 %v1448_v62  ;;  %v1543_v18 = vrot.slane %v1448_v62, 6 }
0x1b6e   :  { %v2985_v63 = vpop.eup %2984 }
0x1b6f   :  { %1451 = vrot.lane.b32.xlu1 %v2985_v63, %s3353_s10 }
0x1be1   :  { %v1452_v2 = vpop.permute.xlu1 %1451 }
0x1be2   :  { %v1454_v28 = vmul.f32 %v2983_v56, %v1452_v2 }
0x1be4   :  { %v1456_v4 = vrot.slane %v1454_v28, 2  ;;  %v2093_v26 = vsel %vm1134_vm3, %v3796_v46, %v1454_v28 }
0x1be6   :  { %1457 = vrot.lane.b32.xlu0 %v1456_v4, %s3342_s21 }
0x1c58   :  { %v1458_v5 = vpop.permute.xlu0 %1457 }
0x1c59   :  { %2669 = vmatmul.mubr.msk.f32.vlgmr.msra.gmra.mrb[10].mxu0 %vm287_vm2, %v1458_v5 }
0x1c5a   :  { %2846 = vmatpush3.bf16.msra.mxu0 %v3755_v12  ;;  %2690 = vmatprep.mubr.msk.f32.mxu0 %vm3351_vm0, %v3352_v1 }
0x1c5b   :  { %2847 = vmatprep.subr.bf16.mxu0 %v3350_v0 }
0x1c5e   :  { %2849 = vmatpush3.bf16.msra.mxu0 %v3758_v15 }
0x1c5f   :  { %2856 = vmatprep.subr.bf16.mxu0 %v3350_v0 }
0x1d2c   :  { %v1527_v6 = vpop.f32.mrb[10].mxu0 }
0x1d2d   :  { %v1532_v7 = vrot.slane %v1527_v6, 4  ;;  %v2670_v8 = vpop.f32.mrb[11].mxu0 }
0x1d2f   :  { %v1534_v9 = vadd.f32 %v1532_v7, %v3790_v31 }
0x1d31   :  { %2986 = vtanh.f32 %v1534_v9  ;;  %v2392_v11 = vmul.f32 -1.442695, %v1534_v9 }
0x1d33   :  { %2988 = vpow2.f32 %v2392_v11 }
0x1d3b   :  { %v2987_v10 = vpop.eup %2986 }
0x1d3c   :  { %1547 = vrot.lane.b32.xlu1 %v2987_v10, %s3353_s10 }
0x1d3d   :  { %v2989_v50 = vpop.eup %2988 }
0x1d3e   :  { %v1538_v14 = vadd.f32 1.0, %v2989_v50 }
0x1d40   :  { %2990 = vrcp.f32 %v1538_v14 }
0x1d4a   :  { %v2991_v13 = vpop.eup %2990 }
0x1d4b   :  { %v1545_v20 = vmul.f32 %v2991_v13, %v1543_v18 }
0x1dae   :  { %v1548_v16 = vpop.permute.xlu1 %1547 }
0x1daf   :  { %v1550_v17 = vmul.f32 %v2991_v13, %v1548_v16 }
0x1db1   :  { %1552 = vrot.lane.b32.xlu0 %v1550_v17, %s3342_s21 }
0x1e23   :  { %v1553_v21 = vpop.permute.xlu0 %1552 }
0x1e24   :  { %v1555_v22 = vadd.f32 %v1553_v21, %v1545_v20 }
0x1e26   :  { %2992 = vtanh.f32 %v1555_v22  ;;  %v1650_v45 = vrot.slane %v1555_v22, 6 }
0x1e30   :  { %v2993_v23 = vpop.eup %2992 }
0x1e31   :  { %1558 = vrot.lane.b32.xlu1 %v2993_v23, %s3353_s10 }
0x1ea3   :  { %v1559_v24 = vpop.permute.xlu1 %1558 }
0x1ea4   :  { %v1561_v25 = vmul.f32 %v2991_v13, %v1559_v24 }
0x1ea6   :  { %v1563_v29 = vrot.slane %v1561_v25, 4  ;;  %v2094_v32 = vsel %vm1136_vm4, %v2093_v26, %v1561_v25 }
0x1ea8   :  { %1564 = vrot.lane.b32.xlu0 %v1563_v29, %s3342_s21 }
0x1f1a   :  { %v1565_v33 = vpop.permute.xlu0 %1564 }
0x1f1b   :  { %2680 = vmatmul.mubr.msk.f32.vlgmr.msra.gmra.mrb[14].mxu1 %vm287_vm2, %v1565_v33 }
0x1f1c   :  { %2852 = vmatpush3.bf16.msra.mxu1 %v3755_v12  ;;  %2701 = vmatprep.mubr.msk.f32.mxu1 %vm3351_vm0, %v3352_v1 }
0x1f1d   :  { %2853 = vmatprep.subr.bf16.mxu1 %v3350_v0 }
0x1f20   :  { %2855 = vmatpush3.bf16.msra.mxu1 %v3758_v15 }
0x1f21   :  { %2862 = vmatprep.subr.bf16.mxu1 %v3350_v0 }
0x1fee   :  { %v1634_v34 = vpop.f32.mrb[14].mxu1 }
0x1fef   :  { %v1639_v35 = vrot.slane %v1634_v34, 2  ;;  %v2681_v36 = vpop.f32.mrb[15].mxu1 }
0x1ff1   :  { %v1641_v37 = vadd.f32 %v1639_v35, %v3790_v31 }
0x1ff3   :  { %2994 = vtanh.f32 %v1641_v37  ;;  %v2394_v39 = vmul.f32 -1.442695, %v1641_v37 }
0x1ff5   :  { %2996 = vpow2.f32 %v2394_v39 }
0x1ffd   :  { %v2995_v38 = vpop.eup %2994 }
0x1ffe   :  { %1654 = vrot.lane.b32.xlu1 %v2995_v38, %s3353_s10 }
0x1fff   :  { %v2997_v40 = vpop.eup %2996 }
0x2000   :  { %v1645_v41 = vadd.f32 1.0, %v2997_v40 }
0x2002   :  { %2998 = vrcp.f32 %v1645_v41 }
0x200c   :  { %v2999_v42 = vpop.eup %2998 }
0x200d   :  { %v1652_v46 = vmul.f32 %v2999_v42, %v1650_v45 }
0x2070   :  { %v1655_v43 = vpop.permute.xlu1 %1654 }
0x2071   :  { %v1657_v44 = vmul.f32 %v2999_v42, %v1655_v43 }
0x2073   :  { %1659 = vrot.lane.b32.xlu0 %v1657_v44, %s3342_s21 }
0x20e5   :  { %v1660_v30 = vpop.permute.xlu0 %1659 }
0x20e6   :  { %v1662_v47 = vadd.f32 %v1660_v30, %v1652_v46 }
0x20e8   :  { %3000 = vtanh.f32 %v1662_v47  ;;  %v1754_v2 = vrot.slane %v1662_v47, 6 }
0x20f2   :  { %v3001_v31 = vpop.eup %3000 }
0x20f3   :  { %1665 = vrot.lane.b32.xlu1 %v3001_v31, %s3353_s10 }
0x2165   :  { %v1666_v48 = vpop.permute.xlu1 %1665 }
0x2166   :  { %v1668_v49 = vmul.f32 %v2999_v42, %v1666_v48 }
0x2168   :  { %v1670_v51 = vrot.slane %v1668_v49, 6  ;;  %v3839_v52 = vsel %vm1138_vm5, %v2094_v32, %v1668_v49 }
0x216a   :  { %1671 = vrot.lane.b32.xlu0 %v1670_v51, %s3342_s21 }
0x21dc   :  { %v1672_v53 = vpop.permute.xlu0 %1671 }
0x21dd   :  { %2691 = vmatmul.mubr.msk.f32.vlgmr.msra.gmra.mrb[12].mxu0 %vm287_vm2, %v1672_v53 }
0x21de   :  { %2858 = vmatpush3.bf16.msra.mxu0 %v3755_v12  ;;  %2712 = vmatprep.mubr.msk.f32.mxu0 %vm3351_vm0, %v3352_v1 }
0x21df   :  { %2859 = vmatprep.subr.bf16.mxu0 %v3350_v0 }
0x21e2   :  { %2861 = vmatpush3.bf16.msra.mxu0 %v3758_v15 }
0x22b0   :  { %v1741_v54 = vpop.f32.mrb[12].mxu0 }
0x22b1   :  { %v1745_v55 = vadd.f32 %v1741_v54, %v3788_v27  ;;  %v2692_v56 = vpop.f32.mrb[13].mxu0 }
0x22b3   :  { %3002 = vtanh.f32 %v1745_v55  ;;  %v2396_v58 = vmul.f32 -1.442695, %v1745_v55 }
0x22b5   :  { %3004 = vpow2.f32 %v2396_v58 }
0x22bd   :  { %v3003_v57 = vpop.eup %3002 }
0x22be   :  { %1758 = vrot.lane.b32.xlu1 %v3003_v57, %s3353_s10 }
0x22bf   :  { %v3005_v59 = vpop.eup %3004 }
0x22c0   :  { %v1749_v60 = vadd.f32 1.0, %v3005_v59 }
0x22c2   :  { %3006 = vrcp.f32 %v1749_v60 }
0x22cc   :  { %v3007_v61 = vpop.eup %3006 }
0x22cd   :  { %v1756_v28 = vmul.f32 %v3007_v61, %v1754_v2 }
0x2330   :  { %v1759_v62 = vpop.permute.xlu1 %1758 }
0x2331   :  { %v1761_v63 = vmul.f32 %v3007_v61, %v1759_v62 }
0x2333   :  { %1763 = vrot.lane.b32.xlu0 %v1761_v63, %s3342_s21 }
0x23a5   :  { %v1764_v4 = vpop.permute.xlu0 %1763 }
0x23a6   :  { %v1766_v5 = vadd.f32 %v1764_v4, %v1756_v28 }
0x23a8   :  { %3008 = vtanh.f32 %v1766_v5 }
0x23b2   :  { %v3009_v6 = vpop.eup %3008 }
0x23b3   :  { %1769 = vrot.lane.b32.xlu1 %v3009_v6, %s3353_s10 }
0x2425   :  { %v1770_v7 = vpop.permute.xlu1 %1769 }
0x2426   :  { %v3852_v8 = vmul.f32 %v3007_v61, %v1770_v7 }
0x2428   :  { %1774 = vrot.lane.b32.xlu0 %v3852_v8, %s3342_s21 }
0x249a   :  { %v1775_v9 = vpop.permute.xlu0 %1774 }
0x249b   :  { %2702 = vmatmul.mubr.msk.f32.vlgmr.msra.gmra.mrb[16].mxu1 %vm287_vm2, %v1775_v9  ;;  %v2100_v9 = vld [vmem:[#allocation13 + $0x8] sm:$0xff] }
0x249c   :  { %2864 = vmatpush3.bf16.msra.mxu1 %v3755_v12  ;;  %2723 = vmatprep.mubr.msk.f32.mxu1 %vm3351_vm0, %v3352_v1 }
0x249d   :  { %2865 = vmatprep.subr.bf16.mxu1 %v3350_v0  ;;  %v1860_v0 = vrot.slane %v1766_v5, 6 }
0x24a0   :  { %2867 = vmatpush3.bf16.msra.mxu1 %v3758_v15 }
0x256e   :  { %v1844_v10 = vpop.f32.mrb[16].mxu1 }
0x256f   :  { %v1849_v11 = vrot.slane %v1844_v10, 6  ;;  %v2703_v50 = vpop.f32.mrb[17].mxu1 }
0x2571   :  { %v1851_v14 = vadd.f32 %v1849_v11, %v3788_v27  ;;  %v2102_v11 = vld [vmem:[#allocation13 + $0x18] sm:$0xff] }
0x2573   :  { %3010 = vtanh.f32 %v1851_v14  ;;  %v2398_v16 = vmul.f32 -1.442695, %v1851_v14  ;;  %v2195_v14 = vld [vmem:[#allocation16] sm:$0xff] }
0x2575   :  { %3012 = vpow2.f32 %v2398_v16 }
0x257d   :  { %v3011_v13 = vpop.eup %3010 }
0x257e   :  { %1864 = vrot.lane.b32.xlu1 %v3011_v13, %s3353_s10  ;;  %v2196_v13 = vld [vmem:[#allocation16 + $0x8] sm:$0xff] }
0x257f   :  { %v3013_v17 = vpop.eup %3012 }
0x2580   :  { %v1855_v12 = vadd.f32 1.0, %v3013_v17  ;;  %v2876_v17 = vpack.c.bf16 %v2196_v13, %v2195_v14 }
0x2582   :  { %3014 = vrcp.f32 %v1855_v12  ;;  %2877 = vmatprep.subr.bf16.mxu1 %v2876_v17 }
0x258c   :  { %v3015_v18 = vpop.eup %3014 }
0x258d   :  { %v1862_v15 = vmul.f32 %v3015_v18, %v1860_v0 }
0x25f0   :  { %v1865_v1 = vpop.permute.xlu1 %1864 }
0x25f1   :  { %v1867_v20 = vmul.f32 %v3015_v18, %v1865_v1 }
0x25f3   :  { %1869 = vrot.lane.b32.xlu0 %v1867_v20, %s3342_s21 }
0x2665   :  { %v1870_v21 = vpop.permute.xlu0 %1869 }
0x2666   :  { %v1872_v22 = vadd.f32 %v1870_v21, %v1862_v15  ;;  %v2197_v15 = vld [vmem:[#allocation16 + $0x10] sm:$0xff]  ;;  %v2198_v21 = vld [vmem:[#allocation16 + $0x18] sm:$0xff] }
0x2668   :  { %3016 = vtanh.f32 %v1872_v22  ;;  %v1967_v43 = vrot.slane %v1872_v22, 6  ;;  %v2880_v22 = vpack.c.bf16 %v2198_v21, %v2197_v15 }
0x2672   :  { %v3017_v23 = vpop.eup %3016 }
0x2673   :  { %1875 = vrot.lane.b32.xlu1 %v3017_v23, %s3353_s10  ;;  %v2403_v23 = vld [vmem:[#allocation14] ss:$0 sm:$0xff] }
0x26e5   :  { %v1876_v24 = vpop.permute.xlu1 %1875 }
0x26e6   :  { %v1878_v25 = vmul.f32 %v3015_v18, %v1876_v24 }
0x26e8   :  { %v1880_v26 = vrot.slane %v1878_v25, 2  ;;  %v2096_v48 = vsel %vm1134_vm3, %v3852_v8, %v1878_v25  ;;  %v2099_v8 = vld [vmem:[#allocation13] sm:$0xff] }
0x26ea   :  { %1881 = vrot.lane.b32.xlu0 %v1880_v26, %s3342_s21 }
0x275c   :  { %v1882_v29 = vpop.permute.xlu0 %1881 }
0x275d   :  { %2713 = vmatmul.mubr.msk.f32.vlgmr.msra.gmra.mrb[14].mxu0 %vm287_vm2, %v1882_v29 }
0x2830   :  { %v1951_v32 = vpop.f32.mrb[14].mxu0 }
0x2831   :  { %v1956_v33 = vrot.slane %v1951_v32, 4  ;;  %v2714_v34 = vpop.f32.mrb[15].mxu0 }
0x2833   :  { %v1958_v35 = vadd.f32 %v1956_v33, %v3788_v27 }
0x2835   :  { %3018 = vtanh.f32 %v1958_v35  ;;  %v2400_v37 = vmul.f32 -1.442695, %v1958_v35 }
0x2837   :  { %3020 = vpow2.f32 %v2400_v37 }
0x283f   :  { %v3019_v36 = vpop.eup %3018 }
0x2840   :  { %1971 = vrot.lane.b32.xlu1 %v3019_v36, %s3353_s10 }
0x2841   :  { %v3021_v38 = vpop.eup %3020 }
0x2842   :  { %v1962_v39 = vadd.f32 1.0, %v3021_v38 }
0x2844   :  { %3022 = vrcp.f32 %v1962_v39 }
0x284e   :  { %v3023_v40 = vpop.eup %3022 }
0x284f   :  { %v1969_v44 = vmul.f32 %v3023_v40, %v1967_v43 }
0x28b2   :  { %v1972_v41 = vpop.permute.xlu1 %1971 }
0x28b3   :  { %v1974_v42 = vmul.f32 %v3023_v40, %v1972_v41 }
0x28b5   :  { %1976 = vrot.lane.b32.xlu0 %v1974_v42, %s3342_s21 }
0x2927   :  { %v1977_v45 = vpop.permute.xlu0 %1976 }
0x2928   :  { %v1979_v46 = vadd.f32 %v1977_v45, %v1969_v44 }
0x292a   :  { %3024 = vtanh.f32 %v1979_v46 }
0x2934   :  { %v3025_v30 = vpop.eup %3024 }
0x2935   :  { %1982 = vrot.lane.b32.xlu1 %v3025_v30, %s3353_s10 }
0x29a7   :  { %v1983_v47 = vpop.permute.xlu1 %1982 }
0x29a8   :  { %v1985_v31 = vmul.f32 %v3023_v40, %v1983_v47 }
0x29aa   :  { %v1987_v49 = vrot.slane %v1985_v31, 4  ;;  %v2097_v51 = vsel %vm1136_vm4, %v2096_v48, %v1985_v31 }
0x29ac   :  { %1988 = vrot.lane.b32.xlu0 %v1987_v49, %s3342_s21 }
0x2a1e   :  { %v1989_v53 = vpop.permute.xlu0 %1988 }
0x2a1f   :  { %2724 = vmatmul.mubr.msk.f32.vlgmr.msra.gmra.mrb[18].mxu1 %vm287_vm2, %v1989_v53 }
0x2a20   :  { %2879 = vmatpush3.bf16.msra.mxu1 %v2876_v17 }
0x2a21   :  { %2881 = vmatprep.subr.bf16.mxu1 %v2880_v22 }
0x2a24   :  { %2883 = vmatpush3.bf16.msra.mxu1 %v2880_v22 }
0x2af2   :  { %v2058_v54 = vpop.f32.mrb[18].mxu1 }
0x2af3   :  { %v2063_v55 = vrot.slane %v2058_v54, 2  ;;  %v2725_v56 = vpop.f32.mrb[19].mxu1 }
0x2af5   :  { %v2065_v57 = vadd.f32 %v2063_v55, %v3788_v27  ;;  %v2074_v27 = vrot.slane %v1979_v46, 6 }
0x2af7   :  { %3026 = vtanh.f32 %v2065_v57  ;;  %v2402_v59 = vmul.f32 -1.442695, %v2065_v57 }
0x2af9   :  { %3028 = vpow2.f32 %v2402_v59 }
0x2b01   :  { %v3027_v58 = vpop.eup %3026 }
0x2b02   :  { %2078 = vrot.lane.b32.xlu1 %v3027_v58, %s3353_s10 }
0x2b03   :  { %v3029_v60 = vpop.eup %3028 }
0x2b04   :  { %v2069_v61 = vadd.f32 1.0, %v3029_v60 }
0x2b06   :  { %3030 = vrcp.f32 %v2069_v61 }
0x2b10   :  { %v3031_v62 = vpop.eup %3030 }
0x2b11   :  { %v2076_v28 = vmul.f32 %v3031_v62, %v2074_v27 }
0x2b74   :  { %v2079_v63 = vpop.permute.xlu1 %2078 }
0x2b75   :  { %v2081_v2 = vmul.f32 %v3031_v62, %v2079_v63 }
0x2b77   :  { %2083 = vrot.lane.b32.xlu0 %v2081_v2, %s3342_s21 }
0x2b7b   :  { %2112 = vrot.lane.b32.xlu0 %v3839_v52, %s3342_s21 }
0x2b7f   :  { %2290 = vrot.lane.b32.xlu0 %v3772_v19, %s3342_s21  ;;  %v2101_v19 = vld [vmem:[#allocation13 + $0x10] sm:$0xff] }
0x2b80   :  { %v2872_v50 = vpack.c.bf16 %v2102_v11, %v2101_v19 }
0x2b83   :  { %2302 = vrot.lane.b32.xlu0 %v3751_v3, %s3354_s6  ;;  %v2868_v3 = vpack.c.bf16 %v2100_v9, %v2099_v8 }
0x2b85   :  { %2869 = vmatprep.subr.bf16.mxu0 %v2868_v3 }
0x2b86   :  { %2871 = vmatpush3.bf16.msra.mxu0 %v2868_v3 }
0x2b87   :  { %2873 = vmatprep.subr.bf16.mxu0 %v2872_v50 }
0x2b8a   :  { %2875 = vmatpush3.bf16.msra.mxu0 %v2872_v50 }
0x2be9   :  { %v2084_v4 = vpop.permute.xlu0 %2083 }
0x2bea   :  { %v2086_v5 = vadd.f32 %v2084_v4, %v2076_v28 }
0x2bec   :  { %3032 = vtanh.f32 %v2086_v5 }
0x2bed   :  { %v2113_v6 = vpop.permute.xlu0 %2112 }
0x2bee   :  { %2734 = vmatprep.mubr.msk.f32.mxu0 %vm287_vm2, %v2113_v6 }
0x2bf1   :  { %v2291_v7 = vpop.permute.xlu0 %2290 }
0x2bf2   :  { %2294 = vst.msk [vmem:[#allocation20 - $0x6] sm:$0xc0] %vm2293_vm6, %v2291_v7 }
0x2bf5   :  { %v2303_v52 = vpop.permute.xlu0 %2302 }
0x2bf6   :  { %v3033_v10 = vpop.eup %3032  ;;  %2305 = vst.msk [vmem:[#allocation22 - $0x6] sm:$0xc0] %vm2293_vm6, %v2303_v52 }
0x2bf7   :  { %2089 = vrot.lane.b32.xlu1 %v3033_v10, %s3353_s10 }
0x2c69   :  { %v2090_v16 = vpop.permute.xlu1 %2089 }
0x2c6a   :  { %v2092_v12 = vmul.f32 %v3031_v62, %v2090_v16 }
0x2c6c   :  { %v2098_v18 = vsel %vm1138_vm5, %v2097_v51, %v2092_v12 }
0x2c6d   :  { %2114 = vrot.lane.b32.xlu1 %v2098_v18, %s3342_s21 }
0x2c71   :  { %2296 = vrot.lane.b32.xlu1 %v2092_v12, %s3342_s21 }
0x2c75   :  { %2307 = vrot.lane.b32.xlu1 %v2086_v5, %s3354_s6 }
0x2cdf   :  { %v2115_v1 = vpop.permute.xlu1 %2114 }
0x2ce0   :  { %2735 = vmatmul.mubr.msk.f32.vlgmr.msra.gmra.mrb[16].mxu0 %vm287_vm2, %v2115_v1 }
0x2ce3   :  { %v2297_v20 = vpop.permute.xlu1 %2296 }
0x2ce4   :  { %2300 = vst.msk [vmem:[#allocation20 - $0x4] sm:$0xc0] %vm2293_vm6, %v2297_v20 }
0x2ce7   :  { %v2308_v0 = vpop.permute.xlu1 %2307 }
0x2ce8   :  { %2311 = vst.msk [vmem:[#allocation22 - $0x4] sm:$0xc0] %vm2293_vm6, %v2308_v0 }
0x2db3   :  { %v2736_v24 = vpop.f32.mrb[16].mxu0 }
0x2db4   :  { %v2186_v25 = vpop.f32.mrb[17].mxu0  ;;  %v2192_v29 = vadd.f32 %v2736_v24, %v2403_v23 }
0x2db5   :  { %v2187_v26 = vadd.f32 %v2403_v23, %v2186_v25 }
0x2db7   :  { %2745 = vmatprep.mubr.msk.f32.mxu1 %vm287_vm2, %v2187_v26 }
0x2db8   :  { %2746 = vmatmul.mubr.msk.f32.vlgmr.msra.gmra.mrb[20].mxu1 %vm287_vm2, %v2192_v29 }
0x2db9   :  { %3265 = shalt.err (!%p3262_p0)
}
0x2dba   :  { %s3266_s24 = scalar_lea.hbm %s3958_s14, 64 }
0x2dbb   :  { %p3267_p1 = scmp.ne.s32.totalorder %s3958_s14, %s3266_s24  ;;  %p3270_p2 = scmp.lt.u32.totalorder %s3266_s24, %s3958_s14 }
0x2dbd   :  { %p3272_p3 = pnand %p3270_p2, %p3267_p1 }
0x2dbf   :  { %3275 = shalt.err (!%p3272_p3)
}
0x2dc0   :  { %2335 = dma.vmem_to_hbm [thread:$0]  %s2330_s19, 64, %s3958_s14, [#allocation21], %s3342_s21, %s3342_s21, %s3343_s1  }
0x2dc1   :  { %s3356_s26 = smov [#allocation22]  }
0x2dc2   :  { %s2341_s27 = sshll.u32 %s3356_s26, 4  ;;  %s2342_s27 = int_to_ptr.vmem [resolvable:$true] %s2341_s27 }
0x2dc3   :  { %s3276_s0 = scalar_lea.vmem %s2342_s27, 64  ;;  %p3281_p5 = scmp.lt.s32.totalorder %s2342_s27, %s2342_s27 }
0x2dc4   :  { %p3277_p4 = scmp.ne.s32.totalorder %s2342_s27, %s3276_s0  ;;  %p3282_p6 = scmp.lt.s32.totalorder %s3276_s0, %s3276_s0 }
0x2dc6   :  { %p3283_p7 = por %p3282_p6, %p3281_p5 }
0x2dc8   :  { %p3284_p8 = pnand %p3283_p7, %p3277_p4 }
0x2dca   :  { %3287 = shalt.err (!%p3284_p8)
}
0x2dcb   :  { %s3288_s9 = scalar_lea.hbm %s3959_s15, 64 }
0x2dcc   :  { %p3289_p9 = scmp.ne.s32.totalorder %s3959_s15, %s3288_s9  ;;  %p3292_p10 = scmp.lt.u32.totalorder %s3288_s9, %s3959_s15 }
0x2dce   :  { %p3294_p11 = pnand %p3292_p10, %p3289_p9 }
0x2dd0   :  { %3297 = shalt.err (!%p3294_p11)
}
0x2dd1   :  { %2347 = dma.vmem_to_hbm [thread:$0]  %s2342_s27, 64, %s3959_s15, [#allocation21], %s3342_s21, %s3342_s21, %s3343_s1   ;;  %v2406_v32 = vld [vmem:[#allocation17] ss:$0 sm:$0xff] }
0x2dd2   :  { %s3357_s6 = smov [#allocation19]  }
0x2dd3   :  { %s2317_s5 = sshll.u32 %s3357_s6, 4  ;;  %s2318_s5 = int_to_ptr.vmem [resolvable:$true] %s2317_s5 }
0x2dd4   :  { %s3298_s19 = scalar_lea.vmem %s2318_s5, 256  ;;  %p3303_p13 = scmp.lt.s32.totalorder %s2318_s5, %s2318_s5 }
0x2dd5   :  { %p3299_p12 = scmp.ne.s32.totalorder %s2318_s5, %s3298_s19  ;;  %p3304_p0 = scmp.lt.s32.totalorder %s3298_s19, %s3298_s19 }
0x2dd7   :  { %p3305_p1 = por %p3304_p0, %p3303_p13 }
0x2dd9   :  { %p3306_p2 = pnand %p3305_p1, %p3299_p12 }
0x2e8b   :  { %v2747_v33 = vpop.f32.mrb[20].mxu1 }
0x2e8c   :  { %v2284_v34 = vadd.f32 %v2747_v33, %v2406_v32  ;;  %v2278_v35 = vpop.f32.mrb[21].mxu1 }
0x2e8d   :  { %v2279_v36 = vadd.f32 %v2406_v32, %v2278_v35 }
0x2e8e   :  { %2288 = vst [vmem:[#allocation19 + $0x8] sm:$0xff] %v2284_v34 }
0x2e8f   :  { %2287 = vst [vmem:[#allocation19] sm:$0xff] %v2279_v36 }
0x2e90   :  { %3309 = shalt.err (!%p3306_p2)
}
0x2e91   :  { %s3310_s15 = scalar_lea.hbm %s3957_s13, 256 }
0x2e92   :  { %p3311_p3 = scmp.ne.s32.totalorder %s3957_s13, %s3310_s15  ;;  %p3314_p4 = scmp.lt.u32.totalorder %s3310_s15, %s3957_s13 }
0x2e94   :  { %p3316_p5 = pnand %p3314_p4, %p3311_p3 }
0x2e96   :  { %3319 = shalt.err (!%p3316_p5)
}
0x2e97   :  { %2323 = dma.vmem_to_hbm [thread:$0]  %s2318_s5, 256, %s3957_s13, [#allocation4], %s3338_s30, %s3338_s30, %s3339_s16  }
0x2e98   :  { %3332 = dma.done.wait [#allocation4], 256  }
0x2e99   :  { %3333 = vsyncadd [#allocation4], 4294967040 }
0x2e9a   :  { %3334 = dma.done.wait [#allocation21], 128  }
0x2e9b   :  { %3335 = vsyncadd [#allocation21], 4294967168 }
0x2e9c   :  { %2357 = vsyncpa [#allocation3], 1 }
0x2e9d   :  { %2358 = vsyncpa [#allocation6], 1 }
0x2e9e   :  { %2359 = vsyncpa [#allocation9], 1 }
0x2e9f   :  { %2360 = vsyncpa [#allocation12], 1 }
0x2ea0   :  { %2361 = vsyncpa [#allocation15], 1 }
0x2ea1   :  { %2362 = vsyncpa [#allocation18], 1 }
0x2ea2   :  { %2363 = vsyncpa [#allocation4], 1 }
0x2ea3   :  { %2364 = vsyncpa [#allocation21], 1 }

</bundles_post_ra>
